<compile_context>
chip_gen: v7x
topology: tpu7x:2x2x1
jax: 0.10.0
libtpu: 0.0.40
codegen_flags: <defaults>
</compile_context>

<pallas_src>
import functools

import jax
import jax.numpy as jnp
import numpy as np
from jax.experimental import pallas as pl
from jax.experimental.pallas import tpu as pltpu


def _softmax_dim0(x):
    # Reproduces F.softmax(x) (implicit dim) on a 3-D tensor: softmax over dim 0.
    m = jnp.max(x, axis=0, keepdims=True)
    e = jnp.exp(x - m)
    s = jnp.sum(e, axis=0, keepdims=True)
    # EUP approximate reciprocal + two Newton-Raphson refinements (f32-exact),
    # keeping the divide off the VALU.
    r = pl.reciprocal(s, approx=True)
    r = r * (2.0 - s * r)
    r = r * (2.0 - s * r)
    return e * r


def memn2n_kernel(stories_ref, queries_ref, acb_ref, hw_ref, out_ref, xacc_ref,
                  *, hops, dp, rows_s, rows_q):
    s_idx = pl.program_id(0)
    n_s = pl.num_programs(0)
    Bsz, _, L, E = stories_ref.shape
    _, Q, _, _ = queries_ref.shape
    f32 = jnp.float32

    # ---- Streaming accumulation of the stacked row matrix -------------------
    #   rows [0, B*L)        : sum_s stories[b, s, l, :]
    #   rows [B*L, B*L+B*Q)  : sum_l queries[b, q, l, :]
    @pl.when(s_idx == 0)
    def _():
        xacc_ref[...] = jnp.zeros_like(xacc_ref)
        qsum = queries_ref[...].sum(axis=2).reshape(rows_q, E)      # (B*Q, E)
        xacc_ref[pl.ds(rows_s, rows_q), :] = qsum

    xacc_ref[pl.ds(0, rows_s), :] += stories_ref[...].reshape(rows_s, E)

    # ---- All hop computation on the final grid step --------------------------
    @pl.when(s_idx == n_s - 1)
    def _():
        cols_ac = 2 * hops * dp

        # One MXU matmul projects the story-sum rows through all hops' A_i/C_i
        # and the query-sum rows through B (packed lane-dense in the wrapper).
        proj = jnp.dot(xacc_ref[...], acb_ref[...],
                       preferred_element_type=f32)                  # (Rp, cols_ac+Dp)

        m_all = proj[:rows_s, :cols_ac].reshape(Bsz, L, cols_ac)    # (B, L, 2*hops*Dp)
        u = proj[rows_s:rows_s + rows_q, cols_ac:].reshape(Bsz, Q, dp)  # (B, Q, Dp)

        Hm = hw_ref[:, :dp]          # (Dp, Dp)  zero-padded H
        Wm = hw_ref[:, dp:]          # (Dp, Kp)  zero-padded W

        for i in range(hops):        # hops is static -> unrolled
            m_in = m_all[:, :, (2 * i) * dp:(2 * i + 1) * dp]       # (B, L, Dp)
            c = m_all[:, :, (2 * i + 1) * dp:(2 * i + 2) * dp]      # (B, L, Dp)

            # scores[b,q,l] = sum_d u[b,q,d] * m_in[b,l,d]
            scores = jax.lax.dot_general(
                u, m_in, (((2,), (2,)), ((0,), (0,))),
                preferred_element_type=f32)                         # (B, Q, L)
            p = _softmax_dim0(scores)                               # implicit-dim softmax -> axis 0

            # o[b,q,d] = sum_l p[b,q,l] * c[b,l,d]
            o = jax.lax.dot_general(
                p, c, (((2,), (1,)), ((0,), (0,))),
                preferred_element_type=f32)                         # (B, Q, Dp)

            u = jnp.dot(u.reshape(Bsz * Q, dp), Hm,
                        preferred_element_type=f32).reshape(Bsz, Q, dp) + o

        logits = jnp.dot(u.reshape(Bsz * Q, dp), Wm,
                         preferred_element_type=f32).reshape(Bsz, Q, -1)
        out_ref[...] = _softmax_dim0(logits)                        # lane-dense (Kp=128) store


def memn2n_forward(stories, queries, A, B, C, H, W, *, hops):
    Bsz, S, L, E = stories.shape
    Q = queries.shape[1]
    D = B.shape[1]
    K = W.shape[1]
    f32 = jnp.float32

    Dp = ((D + 127) // 128) * 128            # pad memory dim to whole 128-lane blocks
    Kp = ((K + 127) // 128) * 128
    rows_s, rows_q = Bsz * L, Bsz * Q
    Rp = ((rows_s + rows_q + 7) // 8) * 8    # sublane-pad stacked row count

    # Weight slab 1: [A0|C0|A1|C1|...|B], every block zero-padded to Dp lanes.
    A_p = jnp.pad(A.astype(f32), ((0, 0), (0, 0), (0, Dp - D)))      # (hops, E, Dp)
    C_p = jnp.pad(C.astype(f32), ((0, 0), (0, 0), (0, Dp - D)))
    B_p = jnp.pad(B.astype(f32), ((0, 0), (0, Dp - D)))              # (E, Dp)
    AC = jnp.transpose(jnp.stack([A_p, C_p], axis=1), (2, 0, 1, 3))  # (E, hops, 2, Dp)
    ACB = jnp.concatenate([AC.reshape(E, hops * 2 * Dp), B_p], axis=1)

    # Weight slab 2: [H | W], zero-padded to Dp rows and Dp / Kp columns.
    H_p = jnp.zeros((Dp, Dp), f32).at[:D, :D].set(H.astype(f32))
    W_p = jnp.zeros((Dp, Kp), f32).at[:D, :K].set(W.astype(f32))
    HW = jnp.concatenate([H_p, W_p], axis=1)                         # (Dp, Dp+Kp)

    cols = hops * 2 * Dp + Dp
    flops = int(2 * Rp * E * cols                                    # fused projection
                + hops * (2 * 2 * Bsz * Q * L * Dp                   # scores + o
                          + 2 * Bsz * Q * Dp * Dp)                   # u @ H
                + 2 * Bsz * Q * Dp * Kp)                             # logits
    transcendentals = int(hops * Bsz * Q * L + Bsz * Q * Kp)
    bytes_accessed = int(4 * (stories.size + queries.size + ACB.size
                              + HW.size + Bsz * Q * Kp))

    # VMEM footprint (stories streamed over S; everything else resident).
    buf_bytes = 4 * (2 * Bsz * L * max(E, 128)       # stories block (double-buffered)
                     + Bsz * Q * L * max(E, 128)     # queries (resident)
                     + E * cols + Dp * (Dp + Kp)     # weight slabs
                     + Bsz * Q * Kp                  # output
                     + Rp * max(E, 128)              # row-sum accumulator
                     + Rp * cols)                    # projection intermediate
    vmem_limit = int(min(64 * 1024 * 1024, max(8 * 1024 * 1024, 4 * buf_bytes)))

    out = pl.pallas_call(
        functools.partial(memn2n_kernel, hops=hops, dp=Dp,
                          rows_s=rows_s, rows_q=rows_q),
        out_shape=jax.ShapeDtypeStruct((Bsz, Q, Kp), f32),
        grid_spec=pltpu.PrefetchScalarGridSpec(
            num_scalar_prefetch=0,
            grid=(S,),                                              # stream stories over S
            in_specs=[
                pl.BlockSpec((Bsz, 1, L, E), lambda s: (0, s, 0, 0)),
                pl.BlockSpec((Bsz, Q, L, E), lambda s: (0, 0, 0, 0)),
                pl.BlockSpec((E, cols), lambda s: (0, 0)),
                pl.BlockSpec((Dp, Dp + Kp), lambda s: (0, 0)),
            ],
            out_specs=pl.BlockSpec((Bsz, Q, Kp), lambda s: (0, 0, 0)),
            scratch_shapes=[pltpu.VMEM((Rp, E), f32)],
        ),
        compiler_params=pltpu.CompilerParams(
            dimension_semantics=("arbitrary",),                     # S is a reduction axis
            vmem_limit_bytes=vmem_limit,
        ),
        cost_estimate=pl.CostEstimate(flops=flops,
                                      transcendentals=transcendentals,
                                      bytes_accessed=bytes_accessed),
    )(stories.astype(f32), queries.astype(f32), ACB, HW)

    # Padded logit columns become the uniform 1/B after the dim-0 softmax;
    # they never perturb real columns (per-column softmax) and are dropped here.
    return out[:, :, :K]


def reference_forward(stories, queries, A, B, C, H, W, hops):
    # Pure-JAX mirror of the PyTorch forward (for correctness check).
    u = jnp.einsum('bqle,ed->bqld', queries, B).sum(axis=2)
    for i in range(hops):
        m_in = jnp.einsum('bsle,ed->bsld', stories, A[i]).sum(axis=1)
        c = jnp.einsum('bsle,ed->bsld', stories, C[i]).sum(axis=1)
        scores = jnp.einsum('bqd,bld->bql', u, m_in)
        p = jax.nn.softmax(scores, axis=0)   # implicit-dim F.softmax on 3-D -> dim 0
        o = jnp.einsum('bql,bld->bqd', p, c)
        u = u @ H + o
    return jax.nn.softmax(u @ W, axis=0)


if __name__ == "__main__":
    emb_size = 32
    d = 2 * emb_size
    key_size = 16
    story_size = 4
    sentence_len = 8
    hops = 3
    batch_size = 2
    num_queries = 2

    key = jax.random.PRNGKey(0)
    ks = jax.random.split(key, 7)
    # Deterministic synthetic parameters matching the module's __init__ shapes
    # (normal, std=0.01).
    A = 0.01 * jax.random.normal(ks[0], (hops, emb_size, d), jnp.float32)
    Bp = 0.01 * jax.random.normal(ks[1], (emb_size, d), jnp.float32)
    C = 0.01 * jax.random.normal(ks[2], (hops, emb_size, d), jnp.float32)
    H = 0.01 * jax.random.normal(ks[3], (d, d), jnp.float32)
    W = 0.01 * jax.random.normal(ks[4], (d, key_size), jnp.float32)

    stories = jax.random.normal(
        ks[5], (batch_size, story_size, sentence_len, emb_size), jnp.float32)
    queries = jax.random.normal(
        ks[6], (batch_size, num_queries, sentence_len, emb_size), jnp.float32)

    out = memn2n_forward(stories, queries, A, Bp, C, H, W, hops=hops)
    out = jax.block_until_ready(out)

    ref = reference_forward(stories, queries, A, Bp, C, H, W, hops)
    np.testing.assert_allclose(np.asarray(out), np.asarray(ref),
                               rtol=1e-5, atol=1e-5)
    print("KERNEL_OK")
</pallas_src>

<mosaic_0001>
module attributes {stable_mosaic.version = 11 : i64} {
  func.func @memn2n_kernel(%arg0: i32, %arg1: memref<2x1x8x32xf32, #tpu.memory_space<vmem>>, %arg2: memref<2x2x8x32xf32, #tpu.memory_space<vmem>>, %arg3: memref<32x896xf32, #tpu.memory_space<vmem>>, %arg4: memref<128x256xf32, #tpu.memory_space<vmem>>, %arg5: memref<2x2x128xf32, #tpu.memory_space<vmem>>, %arg6: memref<24x32xf32, #tpu.memory_space<vmem>>) attributes {dimension_semantics = [#tpu.dimension_semantics<arbitrary>], iteration_bounds = array<i64: 4>, scalar_prefetch = 0 : i64, scratch_operands = 1 : i64, tpu.core_type = #tpu.core_type<tc>, window_params = [{transform_indices = @transform_0, window_bounds = array<i64: 2, 1, 8, 32>}, {pipeline_mode = #tpu.pipeline_mode<synchronous>, transform_indices = @transform_1, window_bounds = array<i64: 2, 2, 8, 32>}, {pipeline_mode = #tpu.pipeline_mode<synchronous>, transform_indices = @transform_2, window_bounds = array<i64: 32, 896>}, {pipeline_mode = #tpu.pipeline_mode<synchronous>, transform_indices = @transform_3, window_bounds = array<i64: 128, 256>}, {pipeline_mode = #tpu.pipeline_mode<synchronous>, transform_indices = @transform_4, window_bounds = array<i64: 2, 2, 128>}]} {
    %c0_i32 = arith.constant 0 : i32
    %0 = arith.cmpi eq, %arg0, %c0_i32 : i32
    %1 = arith.extui %0 : i1 to i32
    %c0_i32_0 = arith.constant 0 : i32
    %2 = arith.cmpi ne, %1, %c0_i32_0 : i32
    scf.if %2 {
      %cst = arith.constant 0.000000e+00 : f32
      %11 = vector.broadcast %cst : f32 to vector<24x32xf32>
      %c0_9 = arith.constant 0 : index
      %c0_10 = arith.constant 0 : index
      %12 = vector.load %arg6[%c0_9, %c0_10] : memref<24x32xf32, #tpu.memory_space<vmem>>, vector<24x32xf32>
      tpu.vector_store %arg6[%c0_9, %c0_10], %11 {strides = array<i32>} : memref<24x32xf32, #tpu.memory_space<vmem>>, vector<24x32xf32>,
      %c0_11 = arith.constant 0 : index
      %c0_12 = arith.constant 0 : index
      %c0_13 = arith.constant 0 : index
      %c0_14 = arith.constant 0 : index
      %13 = vector.load %arg2[%c0_11, %c0_12, %c0_13, %c0_14] : memref<2x2x8x32xf32, #tpu.memory_space<vmem>>, vector<2x2x8x32xf32>
      %cst_15 = arith.constant dense<0.000000e+00> : vector<2x2x32xf32>
      %14 = vector.multi_reduction <add>, %13, %cst_15 [2] : vector<2x2x8x32xf32> to vector<2x2x32xf32>
      %15 = vector.shape_cast %14 : vector<2x2x32xf32> to vector<4x32xf32>
      %c16 = arith.constant 16 : index
      %c0_16 = arith.constant 0 : index
      %16 = vector.load %arg6[%c16, %c0_16] : memref<24x32xf32, #tpu.memory_space<vmem>>, vector<4x32xf32>
      tpu.vector_store %arg6[%c16, %c0_16], %15 {strides = array<i32>} : memref<24x32xf32, #tpu.memory_space<vmem>>, vector<4x32xf32>,
    } else {
    }
    %c0 = arith.constant 0 : index
    %c0_1 = arith.constant 0 : index
    %3 = vector.load %arg6[%c0, %c0_1] : memref<24x32xf32, #tpu.memory_space<vmem>>, vector<16x32xf32>
    %c0_2 = arith.constant 0 : index
    %c0_3 = arith.constant 0 : index
    %c0_4 = arith.constant 0 : index
    %c0_5 = arith.constant 0 : index
    %4 = vector.load %arg1[%c0_2, %c0_3, %c0_4, %c0_5] : memref<2x1x8x32xf32, #tpu.memory_space<vmem>>, vector<2x1x8x32xf32>
    %5 = vector.shape_cast %4 : vector<2x1x8x32xf32> to vector<16x32xf32>
    %6 = arith.addf %3, %5 : vector<16x32xf32>
    %c0_6 = arith.constant 0 : index
    %c0_7 = arith.constant 0 : index
    %7 = vector.load %arg6[%c0_6, %c0_7] : memref<24x32xf32, #tpu.memory_space<vmem>>, vector<16x32xf32>
    tpu.vector_store %arg6[%c0_6, %c0_7], %6 {strides = array<i32>} : memref<24x32xf32, #tpu.memory_space<vmem>>, vector<16x32xf32>,
    %c3_i32 = arith.constant 3 : i32
    %8 = arith.cmpi eq, %arg0, %c3_i32 : i32
    %9 = arith.extui %8 : i1 to i32
    %c0_i32_8 = arith.constant 0 : i32
    %10 = arith.cmpi ne, %9, %c0_i32_8 : i32
    scf.if %10 {
      %c0_9 = arith.constant 0 : index
      %c0_10 = arith.constant 0 : index
      %11 = vector.load %arg6[%c0_9, %c0_10] : memref<24x32xf32, #tpu.memory_space<vmem>>, vector<24x32xf32>
      %c0_11 = arith.constant 0 : index
      %c0_12 = arith.constant 0 : index
      %12 = vector.load %arg3[%c0_11, %c0_12] : memref<32x896xf32, #tpu.memory_space<vmem>>, vector<32x896xf32>
      %cst = arith.constant dense<0.000000e+00> : vector<24x896xf32>
      %13 = tpu.matmul %11, %12, %cst {dimension_numbers = #tpu.dot_dimension_numbers<[1], [0], [0], [1], [0, 0, 1, 1], [], []>} : vector<24x32xf32>, vector<32x896xf32>, vector<24x896xf32> -> vector<24x896xf32>
      %14 = vector.extract_strided_slice %13 {offsets = [0, 0], sizes = [16, 768], strides = [1, 1]} : vector<24x896xf32> to vector<16x768xf32>
      %15 = vector.shape_cast %14 : vector<16x768xf32> to vector<2x8x768xf32>
      %16 = vector.extract_strided_slice %13 {offsets = [16, 768], sizes = [4, 128], strides = [1, 1]} : vector<24x896xf32> to vector<4x128xf32>
      %17 = vector.shape_cast %16 : vector<4x128xf32> to vector<2x2x128xf32>
      %c0_13 = arith.constant 0 : index
      %c0_14 = arith.constant 0 : index
      %18 = vector.load %arg4[%c0_13, %c0_14] : memref<128x256xf32, #tpu.memory_space<vmem>>, vector<128x128xf32>
      %c0_15 = arith.constant 0 : index
      %c128 = arith.constant 128 : index
      %19 = vector.load %arg4[%c0_15, %c128] : memref<128x256xf32, #tpu.memory_space<vmem>>, vector<128x128xf32>
      %20 = vector.extract_strided_slice %15 {offsets = [0, 0, 0], sizes = [2, 8, 128], strides = [1, 1, 1]} : vector<2x8x768xf32> to vector<2x8x128xf32>
      %21 = vector.extract_strided_slice %15 {offsets = [0, 0, 128], sizes = [2, 8, 128], strides = [1, 1, 1]} : vector<2x8x768xf32> to vector<2x8x128xf32>
      %cst_16 = arith.constant dense<0.000000e+00> : vector<2x2x8xf32>
      %22 = tpu.matmul %17, %20, %cst_16 {dimension_numbers = #tpu.dot_dimension_numbers<[2], [2], [1], [1], [0, 0, 0, 1, 1, 1], [0], [0]>} : vector<2x2x128xf32>, vector<2x8x128xf32>, vector<2x2x8xf32> -> vector<2x2x8xf32>
      %cst_17 = arith.constant dense<0xFF800000> : vector<2x8xf32>
      %23 = vector.multi_reduction <maximumf>, %22, %cst_17 [0] : vector<2x2x8xf32> to vector<2x8xf32>
      %24 = vector.shape_cast %23 : vector<2x8xf32> to vector<1x2x8xf32>
      %25 = vector.broadcast %24 : vector<1x2x8xf32> to vector<2x2x8xf32>
      %26 = arith.subf %22, %25 : vector<2x2x8xf32>
      %27 = math.exp %26 : vector<2x2x8xf32>
      %cst_18 = arith.constant dense<0.000000e+00> : vector<2x8xf32>
      %28 = vector.multi_reduction <add>, %27, %cst_18 [0] : vector<2x2x8xf32> to vector<2x8xf32>
      %29 = vector.shape_cast %28 : vector<2x8xf32> to vector<1x2x8xf32>
      %30 = tpu.reciprocal %29 {approx = true} : vector<1x2x8xf32> -> vector<1x2x8xf32>
      %31 = arith.mulf %29, %30 : vector<1x2x8xf32>
      %cst_19 = arith.constant 2.000000e+00 : f32
      %32 = vector.broadcast %cst_19 : f32 to vector<1x2x8xf32>
      %33 = arith.subf %32, %31 : vector<1x2x8xf32>
      %34 = arith.mulf %30, %33 : vector<1x2x8xf32>
      %35 = arith.mulf %29, %34 : vector<1x2x8xf32>
      %cst_20 = arith.constant 2.000000e+00 : f32
      %36 = vector.broadcast %cst_20 : f32 to vector<1x2x8xf32>
      %37 = arith.subf %36, %35 : vector<1x2x8xf32>
      %38 = arith.mulf %34, %37 : vector<1x2x8xf32>
      %39 = vector.broadcast %38 : vector<1x2x8xf32> to vector<2x2x8xf32>
      %40 = arith.mulf %27, %39 : vector<2x2x8xf32>
      %cst_21 = arith.constant dense<0.000000e+00> : vector<2x2x128xf32>
      %41 = tpu.matmul %40, %21, %cst_21 {dimension_numbers = #tpu.dot_dimension_numbers<[2], [1], [1], [2], [0, 0, 0, 1, 1, 2], [0], [0]>} : vector<2x2x8xf32>, vector<2x8x128xf32>, vector<2x2x128xf32> -> vector<2x2x128xf32>
      %42 = vector.shape_cast %17 : vector<2x2x128xf32> to vector<4x128xf32>
      %cst_22 = arith.constant dense<0.000000e+00> : vector<4x128xf32>
      %43 = tpu.matmul %42, %18, %cst_22 {dimension_numbers = #tpu.dot_dimension_numbers<[1], [0], [0], [1], [0, 0, 1, 1], [], []>} : vector<4x128xf32>, vector<128x128xf32>, vector<4x128xf32> -> vector<4x128xf32>
      %44 = vector.shape_cast %43 : vector<4x128xf32> to vector<2x2x128xf32>
      %45 = arith.addf %44, %41 : vector<2x2x128xf32>
      %46 = vector.extract_strided_slice %15 {offsets = [0, 0, 256], sizes = [2, 8, 128], strides = [1, 1, 1]} : vector<2x8x768xf32> to vector<2x8x128xf32>
      %47 = vector.extract_strided_slice %15 {offsets = [0, 0, 384], sizes = [2, 8, 128], strides = [1, 1, 1]} : vector<2x8x768xf32> to vector<2x8x128xf32>
      %cst_23 = arith.constant dense<0.000000e+00> : vector<2x2x8xf32>
      %48 = tpu.matmul %45, %46, %cst_23 {dimension_numbers = #tpu.dot_dimension_numbers<[2], [2], [1], [1], [0, 0, 0, 1, 1, 1], [0], [0]>} : vector<2x2x128xf32>, vector<2x8x128xf32>, vector<2x2x8xf32> -> vector<2x2x8xf32>
      %cst_24 = arith.constant dense<0xFF800000> : vector<2x8xf32>
      %49 = vector.multi_reduction <maximumf>, %48, %cst_24 [0] : vector<2x2x8xf32> to vector<2x8xf32>
      %50 = vector.shape_cast %49 : vector<2x8xf32> to vector<1x2x8xf32>
      %51 = vector.broadcast %50 : vector<1x2x8xf32> to vector<2x2x8xf32>
      %52 = arith.subf %48, %51 : vector<2x2x8xf32>
      %53 = math.exp %52 : vector<2x2x8xf32>
      %cst_25 = arith.constant dense<0.000000e+00> : vector<2x8xf32>
      %54 = vector.multi_reduction <add>, %53, %cst_25 [0] : vector<2x2x8xf32> to vector<2x8xf32>
      %55 = vector.shape_cast %54 : vector<2x8xf32> to vector<1x2x8xf32>
      %56 = tpu.reciprocal %55 {approx = true} : vector<1x2x8xf32> -> vector<1x2x8xf32>
      %57 = arith.mulf %55, %56 : vector<1x2x8xf32>
      %cst_26 = arith.constant 2.000000e+00 : f32
      %58 = vector.broadcast %cst_26 : f32 to vector<1x2x8xf32>
      %59 = arith.subf %58, %57 : vector<1x2x8xf32>
      %60 = arith.mulf %56, %59 : vector<1x2x8xf32>
      %61 = arith.mulf %55, %60 : vector<1x2x8xf32>
      %cst_27 = arith.constant 2.000000e+00 : f32
      %62 = vector.broadcast %cst_27 : f32 to vector<1x2x8xf32>
      %63 = arith.subf %62, %61 : vector<1x2x8xf32>
      %64 = arith.mulf %60, %63 : vector<1x2x8xf32>
      %65 = vector.broadcast %64 : vector<1x2x8xf32> to vector<2x2x8xf32>
      %66 = arith.mulf %53, %65 : vector<2x2x8xf32>
      %cst_28 = arith.constant dense<0.000000e+00> : vector<2x2x128xf32>
      %67 = tpu.matmul %66, %47, %cst_28 {dimension_numbers = #tpu.dot_dimension_numbers<[2], [1], [1], [2], [0, 0, 0, 1, 1, 2], [0], [0]>} : vector<2x2x8xf32>, vector<2x8x128xf32>, vector<2x2x128xf32> -> vector<2x2x128xf32>
      %68 = vector.shape_cast %45 : vector<2x2x128xf32> to vector<4x128xf32>
      %cst_29 = arith.constant dense<0.000000e+00> : vector<4x128xf32>
      %69 = tpu.matmul %68, %18, %cst_29 {dimension_numbers = #tpu.dot_dimension_numbers<[1], [0], [0], [1], [0, 0, 1, 1], [], []>} : vector<4x128xf32>, vector<128x128xf32>, vector<4x128xf32> -> vector<4x128xf32>
      %70 = vector.shape_cast %69 : vector<4x128xf32> to vector<2x2x128xf32>
      %71 = arith.addf %70, %67 : vector<2x2x128xf32>
      %72 = vector.extract_strided_slice %15 {offsets = [0, 0, 512], sizes = [2, 8, 128], strides = [1, 1, 1]} : vector<2x8x768xf32> to vector<2x8x128xf32>
      %73 = vector.extract_strided_slice %15 {offsets = [0, 0, 640], sizes = [2, 8, 128], strides = [1, 1, 1]} : vector<2x8x768xf32> to vector<2x8x128xf32>
      %cst_30 = arith.constant dense<0.000000e+00> : vector<2x2x8xf32>
      %74 = tpu.matmul %71, %72, %cst_30 {dimension_numbers = #tpu.dot_dimension_numbers<[2], [2], [1], [1], [0, 0, 0, 1, 1, 1], [0], [0]>} : vector<2x2x128xf32>, vector<2x8x128xf32>, vector<2x2x8xf32> -> vector<2x2x8xf32>
      %cst_31 = arith.constant dense<0xFF800000> : vector<2x8xf32>
      %75 = vector.multi_reduction <maximumf>, %74, %cst_31 [0] : vector<2x2x8xf32> to vector<2x8xf32>
      %76 = vector.shape_cast %75 : vector<2x8xf32> to vector<1x2x8xf32>
      %77 = vector.broadcast %76 : vector<1x2x8xf32> to vector<2x2x8xf32>
      %78 = arith.subf %74, %77 : vector<2x2x8xf32>
      %79 = math.exp %78 : vector<2x2x8xf32>
      %cst_32 = arith.constant dense<0.000000e+00> : vector<2x8xf32>
      %80 = vector.multi_reduction <add>, %79, %cst_32 [0] : vector<2x2x8xf32> to vector<2x8xf32>
      %81 = vector.shape_cast %80 : vector<2x8xf32> to vector<1x2x8xf32>
      %82 = tpu.reciprocal %81 {approx = true} : vector<1x2x8xf32> -> vector<1x2x8xf32>
      %83 = arith.mulf %81, %82 : vector<1x2x8xf32>
      %cst_33 = arith.constant 2.000000e+00 : f32
      %84 = vector.broadcast %cst_33 : f32 to vector<1x2x8xf32>
      %85 = arith.subf %84, %83 : vector<1x2x8xf32>
      %86 = arith.mulf %82, %85 : vector<1x2x8xf32>
      %87 = arith.mulf %81, %86 : vector<1x2x8xf32>
      %cst_34 = arith.constant 2.000000e+00 : f32
      %88 = vector.broadcast %cst_34 : f32 to vector<1x2x8xf32>
      %89 = arith.subf %88, %87 : vector<1x2x8xf32>
      %90 = arith.mulf %86, %89 : vector<1x2x8xf32>
      %91 = vector.broadcast %90 : vector<1x2x8xf32> to vector<2x2x8xf32>
      %92 = arith.mulf %79, %91 : vector<2x2x8xf32>
      %cst_35 = arith.constant dense<0.000000e+00> : vector<2x2x128xf32>
      %93 = tpu.matmul %92, %73, %cst_35 {dimension_numbers = #tpu.dot_dimension_numbers<[2], [1], [1], [2], [0, 0, 0, 1, 1, 2], [0], [0]>} : vector<2x2x8xf32>, vector<2x8x128xf32>, vector<2x2x128xf32> -> vector<2x2x128xf32>
      %94 = vector.shape_cast %71 : vector<2x2x128xf32> to vector<4x128xf32>
      %cst_36 = arith.constant dense<0.000000e+00> : vector<4x128xf32>
      %95 = tpu.matmul %94, %18, %cst_36 {dimension_numbers = #tpu.dot_dimension_numbers<[1], [0], [0], [1], [0, 0, 1, 1], [], []>} : vector<4x128xf32>, vector<128x128xf32>, vector<4x128xf32> -> vector<4x128xf32>
      %96 = vector.shape_cast %95 : vector<4x128xf32> to vector<2x2x128xf32>
      %97 = arith.addf %96, %93 : vector<2x2x128xf32>
      %98 = vector.shape_cast %97 : vector<2x2x128xf32> to vector<4x128xf32>
      %cst_37 = arith.constant dense<0.000000e+00> : vector<4x128xf32>
      %99 = tpu.matmul %98, %19, %cst_37 {dimension_numbers = #tpu.dot_dimension_numbers<[1], [0], [0], [1], [0, 0, 1, 1], [], []>} : vector<4x128xf32>, vector<128x128xf32>, vector<4x128xf32> -> vector<4x128xf32>
      %100 = vector.shape_cast %99 : vector<4x128xf32> to vector<2x2x128xf32>
      %cst_38 = arith.constant dense<0xFF800000> : vector<2x128xf32>
      %101 = vector.multi_reduction <maximumf>, %100, %cst_38 [0] : vector<2x2x128xf32> to vector<2x128xf32>
      %102 = vector.shape_cast %101 : vector<2x128xf32> to vector<1x2x128xf32>
      %103 = vector.broadcast %102 : vector<1x2x128xf32> to vector<2x2x128xf32>
      %104 = arith.subf %100, %103 : vector<2x2x128xf32>
      %105 = math.exp %104 : vector<2x2x128xf32>
      %cst_39 = arith.constant dense<0.000000e+00> : vector<2x128xf32>
      %106 = vector.multi_reduction <add>, %105, %cst_39 [0] : vector<2x2x128xf32> to vector<2x128xf32>
      %107 = vector.shape_cast %106 : vector<2x128xf32> to vector<1x2x128xf32>
      %108 = tpu.reciprocal %107 {approx = true} : vector<1x2x128xf32> -> vector<1x2x128xf32>
      %109 = arith.mulf %107, %108 : vector<1x2x128xf32>
      %cst_40 = arith.constant 2.000000e+00 : f32
      %110 = vector.broadcast %cst_40 : f32 to vector<1x2x128xf32>
      %111 = arith.subf %110, %109 : vector<1x2x128xf32>
      %112 = arith.mulf %108, %111 : vector<1x2x128xf32>
      %113 = arith.mulf %107, %112 : vector<1x2x128xf32>
      %cst_41 = arith.constant 2.000000e+00 : f32
      %114 = vector.broadcast %cst_41 : f32 to vector<1x2x128xf32>
      %115 = arith.subf %114, %113 : vector<1x2x128xf32>
      %116 = arith.mulf %112, %115 : vector<1x2x128xf32>
      %117 = vector.broadcast %116 : vector<1x2x128xf32> to vector<2x2x128xf32>
      %118 = arith.mulf %105, %117 : vector<2x2x128xf32>
      %c0_42 = arith.constant 0 : index
      %c0_43 = arith.constant 0 : index
      %c0_44 = arith.constant 0 : index
      %119 = vector.load %arg5[%c0_42, %c0_43, %c0_44] : memref<2x2x128xf32, #tpu.memory_space<vmem>>, vector<2x2x128xf32>
      tpu.vector_store %arg5[%c0_42, %c0_43, %c0_44], %118 {strides = array<i32>} : memref<2x2x128xf32, #tpu.memory_space<vmem>>, vector<2x2x128xf32>,
    } else {
    }
    return
  }
  func.func @transform_0(%arg0: i32) -> (i32, i32, i32, i32) {
    %c0_i32 = arith.constant 0 : i32
    %c0_i32_0 = arith.constant 0 : i32
    %c0_i32_1 = arith.constant 0 : i32
    %c0_i32_2 = arith.constant 0 : i32
    return %c0_i32, %arg0, %c0_i32_0, %c0_i32_1 : i32, i32, i32, i32
  }
  func.func @transform_1(%arg0: i32) -> (i32, i32, i32, i32) {
    %c0_i32 = arith.constant 0 : i32
    %c0_i32_0 = arith.constant 0 : i32
    %c0_i32_1 = arith.constant 0 : i32
    %c0_i32_2 = arith.constant 0 : i32
    %c0_i32_3 = arith.constant 0 : i32
    return %c0_i32, %c0_i32_0, %c0_i32_1, %c0_i32_2 : i32, i32, i32, i32
  }
  func.func @transform_2(%arg0: i32) -> (i32, i32) {
    %c0_i32 = arith.constant 0 : i32
    %c0_i32_0 = arith.constant 0 : i32
    %c0_i32_1 = arith.constant 0 : i32
    return %c0_i32, %c0_i32_0 : i32, i32
  }
  func.func @transform_3(%arg0: i32) -> (i32, i32) {
    %c0_i32 = arith.constant 0 : i32
    %c0_i32_0 = arith.constant 0 : i32
    %c0_i32_1 = arith.constant 0 : i32
    return %c0_i32, %c0_i32_0 : i32, i32
  }
  func.func @transform_4(%arg0: i32) -> (i32, i32, i32) {
    %c0_i32 = arith.constant 0 : i32
    %c0_i32_0 = arith.constant 0 : i32
    %c0_i32_1 = arith.constant 0 : i32
    %c0_i32_2 = arith.constant 0 : i32
    return %c0_i32, %c0_i32_0, %c0_i32_1 : i32, i32, i32
  }
}

</mosaic_0001>

<bundles_post_ra>
// kernel: tpu_custom_call.1
= control target key start
LH: loop header
LB: loop body
LE: loop exit
PB: predicated region body
PF: predicated region fallthrough
CT: control target
= control target key end

     0   :  { %9 = vsyncpa [#allocation4], 0  ;;  %s3374_s0 = inlined_call_operand.hbm [shape: f32[2,4,8,32], index: 0, kind: input, shape index: {}]   ;;  %s3375_s1 = inlined_call_operand.hbm [shape: f32[2,2,8,32], index: 1, kind: input, shape index: {}]   ;;  %s3376_s2 = inlined_call_operand.hbm [shape: f32[32,896], index: 2, kind: input, shape index: {}]   ;;  %s3377_s3 = inlined_call_operand.hbm [shape: f32[128,256], index: 3, kind: input, shape index: {}]   ;;  %s3378_s4 = inlined_call_operand.hbm [shape: f32[2,2,128], index: 4, kind: output, shape index: {}]  }
   0x1   :  { %11 = vsyncpa [#allocation4 + $0x1], 0 }
   0x2   :  { %12 = vsyncpa [#allocation7], 0 }
   0x3   :  { %13 = vsyncpa [#allocation10], 0 }
   0x4   :  { %14 = vsyncpa [#allocation5], 0  ;;  %s2941_s15 = smov 0   ;;  %s2943_s16 = smov 0  }
   0x5   :  { %s2945_s17 = smov 0   ;;  %s2947_s18 = smov 0  }
   0x6 LB: > { %s2960_s19 = sadd.s32 4294967295, %s2895_s18   ;;  %s2963_s20 = sadd.s32 1, %s2895_s18   ;;  %s2895_s18 = sphi %s2947_s18, %s3404_s18   ;;  %s2891_s17 = sphi %s2945_s17, %s3403_s17   ;;  %s2887_s16 = sphi %s2943_s16, %s3402_s16   ;;  %s2883_s15 = sphi %s2941_s15, %s3401_s15  }
   0x7   : > { %s24_s21 = ssub.s32 %s2895_s18, %s2963_s20  ;;  %s27_s22 = sadd.s32 1, %s2891_s17 }
   0x8   : > { %p25_p0 = scmp.eq.s32.totalorder %s24_s21, 0  ;;  %p34_p1 = scmp.ne.s32.totalorder %s2891_s17, %s2887_s16 }
   0x9   : > { %p35_p2 = scmp.eq.s32.totalorder %s2895_s18, 0  ;;  %p40_p3 = scmp.ne.s32.totalorder %s2887_s16, %s2883_s15 }
   0xa   : > { %s2973_s23 = scalar_select %p25_p0, %s2891_s17, %s27_s22  }
   0xb   : > { %p2975_p4 = por %p35_p2, %p34_p1  ;;  %p3379_p5 = scmp.eq.s32.totalorder %s2960_s19, 0 }
   0xc   : > { %p2116_p6 = scmp.ge.s32.totalorder %s2895_s18, 1  ;;  %p135_p7 = scmp.lt.s32.totalorder %s2895_s18, 5 }
   0xd   : > { %p2984_p8 = por %p3379_p5, %p40_p3  ;;  %s2897_s27 = smov [#allocation6]  }
   0xe   : > { %p2989_p10 = pnand %p2116_p6, %p135_p7  ;;  %s147_s28 = sshll.u32 %s2897_s27, 4  ;;  %s148_s28 = int_to_ptr.vmem [resolvable:$true] %s147_s28 }
   0xf   : > { %s3386_s25 = scalar_select %p2984_p8, 1, 0 }
  0x10   : > { %s3387_s26 = scalar_select %p2989_p10, 1, 0 }
  0x11   : > { %p2612_p11 = pneg %p2989_p10  ;;  %p2629_p13 = scmp.lt.s32.totalorder %s2895_s18, 4 }
  0x12   : > { %s2709_s7 = scalar_lea.hbm %s3375_s1, 512 }
  0x13   : > { %p2997_p12 = pnand %p2612_p11, %p3379_p5  ;;  %p3004_p0 = pnand %p2629_p13, %p2975_p4 }
  0x14   : > { %p2710_p1 = scmp.ne.s32.totalorder %s3375_s1, %s2709_s7  ;;  %p2716_p6 = scmp.lt.u32.totalorder %s2709_s7, %s3375_s1 }
  0x15   : > { %s3389_s30 = scalar_select %p3004_p0, 1, 0 }
  0x16   : > { %p3016_p2 = pneg %p2997_p12 }
  0x18   : > { %p2712_p3 = pnand %p3016_p2, %p2710_p1 }
  0x1a   : > { %p2713_p4 = pneg %p2712_p3 }
  0x1c   : > { %p2718_p7 = pnand %p2716_p6, %p2713_p4 }
  0x1e   : > { %2721 = shalt.err (!%p2718_p7)
}
  0x1f   : > { %s2722_s13 = scalar_lea.vmem %s148_s28, 512  ;;  %p2730_p5 = scmp.lt.s32.totalorder %s148_s28, %s148_s28 }
  0x20   : > { %p2723_p11 = scmp.ne.s32.totalorder %s148_s28, %s2722_s13  ;;  %p2731_p8 = scmp.lt.s32.totalorder %s2722_s13, %s2722_s13 }
  0x22   : > { %p2725_p13 = pnand %p2723_p11, %p3016_p2  ;;  %p2732_p10 = por %p2731_p8, %p2730_p5 }
  0x24   : > { %p2726_p9 = pneg %p2725_p13 }
  0x26   : > { %p2733_p0 = pnand %p2732_p10, %p2726_p9 }
  0x28   : > { %2736 = shalt.err (!%p2733_p0)
}
  0x29   : > { %s3383_s14 = smov 128   ;;  %s3384_s15 = smov 8  }
  0x2a   : > { %2615 = dma.hbm_to_vmem [thread:$0]  (!%p2997_p12), %s3375_s1, 512, %s148_s28, [#allocation7], %s3383_s14, %s3383_s14, %s3384_s15  }
  0x2b   : > { %s2900_s24 = smov [#allocation8]   ;;  %s2737_s7 = scalar_lea.hbm %s3376_s2, 3584 }
  0x2c   : > { %s160_s27 = sshll.u32 %s2900_s24, 4  ;;  %p2738_p5 = scmp.ne.s32.totalorder %s3376_s2, %s2737_s7  ;;  %s161_s27 = int_to_ptr.vmem [resolvable:$true] %s160_s27 }
  0x2d   : > { %p2744_p10 = scmp.lt.u32.totalorder %s2737_s7, %s3376_s2 }
  0x2e   : > { %p2740_p8 = pnand %p2738_p5, %p3016_p2 }
  0x30   : > { %p2741_p9 = pneg %p2740_p8 }
  0x32   : > { %p2746_p0 = pnand %p2744_p10, %p2741_p9 }
  0x34   : > { %2749 = shalt.err (!%p2746_p0)
}
  0x35   : > { %s2750_s28 = scalar_lea.vmem %s161_s27, 3584  ;;  %p2758_p6 = scmp.lt.s32.totalorder %s161_s27, %s161_s27 }
  0x36   : > { %p2751_p1 = scmp.ne.s32.totalorder %s161_s27, %s2750_s28  ;;  %p2759_p7 = scmp.lt.s32.totalorder %s2750_s28, %s2750_s28 }
  0x38   : > { %p2753_p3 = pnand %p2751_p1, %p3016_p2  ;;  %p2760_p11 = por %p2759_p7, %p2758_p6 }
  0x3a   : > { %p2754_p4 = pneg %p2753_p3 }
  0x3c   : > { %p2761_p13 = pnand %p2760_p11, %p2754_p4 }
  0x3e   : > { %2764 = shalt.err (!%p2761_p13)
}
  0x3f   : > { %s2901_s13 = smov 896   ;;  %s2902_s21 = smov 56  }
  0x40   : > { %2618 = dma.hbm_to_vmem [thread:$0]  (!%p2997_p12), %s3376_s2, 3584, %s161_s27, [#allocation7], %s2901_s13, %s2901_s13, %s2902_s21  }
  0x41   : > { %s2903_s5 = smov [#allocation9]   ;;  %s187_s7 = sand.u32 1, %s2891_s17  }
  0x42   : > { %s173_s6 = sshll.u32 %s2903_s5, 4  ;;  %s2765_s11 = scalar_lea.hbm %s3377_s3, 4096  ;;  %s174_s6 = int_to_ptr.vmem [resolvable:$true] %s173_s6 }
  0x43   : > { %p2766_p5 = scmp.ne.s32.totalorder %s3377_s3, %s2765_s11  ;;  %p2772_p10 = scmp.lt.u32.totalorder %s2765_s11, %s3377_s3 }
  0x45   : > { %p2768_p8 = pnand %p2766_p5, %p3016_p2 }
  0x47   : > { %p2769_p9 = pneg %p2768_p8 }
  0x49   : > { %p2774_p0 = pnand %p2772_p10, %p2769_p9 }
  0x4b   : > { %2777 = shalt.err (!%p2774_p0)
}
  0x4c   : > { %s2778_s27 = scalar_lea.vmem %s174_s6, 4096  ;;  %p2786_p6 = scmp.lt.s32.totalorder %s174_s6, %s174_s6 }
  0x4d   : > { %p2779_p1 = scmp.ne.s32.totalorder %s174_s6, %s2778_s27  ;;  %p2787_p7 = scmp.lt.s32.totalorder %s2778_s27, %s2778_s27 }
  0x4f   : > { %p2781_p3 = pnand %p2779_p1, %p3016_p2  ;;  %p2788_p11 = por %p2787_p7, %p2786_p6 }
  0x51   : > { %p2782_p4 = pneg %p2781_p3 }
  0x53   : > { %p2789_p13 = pnand %p2788_p11, %p2782_p4 }
  0x55   : > { %2792 = shalt.err (!%p2789_p13)
}
  0x56   : > { %s2904_s13 = smov 256   ;;  %s2905_s14 = smov 16  }
  0x57   : > { %2621 = dma.hbm_to_vmem [thread:$0]  (!%p2997_p12), %s3377_s3, 4096, %s174_s6, [#allocation10], %s2904_s13, %s2904_s13, %s2905_s14  }
  0x58   : > { %s2121_s22 = sshll.u32 %s187_s7, 4  ;;  %s2122_s10 = sshll.u32 %s2895_s18, 7 }
  0x59   : > { %s3076_s8 = scalar_lea.hbm %s3374_s0, %s2122_s10  ;;  %s191_s9 = scalar_lea.vmem [#allocation3], %s2121_s22 }
  0x5a   : > { %s197_s11 = sshll.u32 %s191_s9, 4  ;;  %s3080_s29 = scalar_lea.sflag [#allocation4], %s187_s7  ;;  %s3078_s11 = int_to_ptr.vmem [resolvable:$true] %s197_s11 }
  0x5b   : > { %s2793_s12 = scalar_lea.hbm %s3076_s8, 256  ;;  %p3391_p12 = scmp.ne.s32.totalorder %s3389_s30, 0 }
  0x5c   : > { %p2794_p2 = scmp.ne.s32.totalorder %s3076_s8, %s2793_s12  ;;  %s2798_s28 = scalar_lea.hbm %s3374_s0, 1024 }
  0x5d   : > { %p2795_p5 = pneg %p3391_p12  ;;  %p2799_p10 = scmp.lt.u32.totalorder %s3076_s8, %s3374_s0 }
  0x5e   : > { %p2800_p0 = scmp.lt.u32.totalorder %s2798_s28, %s2793_s12  ;;  %p2802_p3 = scmp.lt.u32.totalorder %s2793_s12, %s3076_s8 }
  0x5f   : > { %p2796_p8 = pnand %p2795_p5, %p2794_p2 }
  0x60   : > { %p2801_p1 = por %p2800_p0, %p2799_p10 }
  0x61   : > { %p2797_p9 = pneg %p2796_p8 }
  0x62   : > { %p2803_p4 = por %p2802_p3, %p2801_p1 }
  0x64   : > { %p2804_p6 = pnand %p2803_p4, %p2797_p9 }
  0x66   : > { %2807 = shalt.err (!%p2804_p6)
}
  0x67   : > { %s2808_s7 = scalar_lea.vmem %s3078_s11, 256  ;;  %s2906_s14 = smov [#allocation3]  }
  0x68   : > { %p2809_p7 = scmp.ne.s32.totalorder %s3078_s11, %s2808_s7  ;;  %s2813_s15 = sshll.u32 %s2906_s14, 4  ;;  %s2814_s15 = int_to_ptr.vmem [resolvable:$false] %s2813_s15 }
  0x69   : > { %s2815_s21 = scalar_lea.vmem %s2814_s15, 512  ;;  %p2816_p2 = scmp.lt.s32.totalorder %s3078_s11, %s2814_s15 }
  0x6a   : > { %p2811_p11 = pnand %p2809_p7, %p2795_p5  ;;  %p2817_p8 = scmp.lt.s32.totalorder %s2815_s21, %s2808_s7 }
  0x6c   : > { %p2812_p13 = pneg %p2811_p11  ;;  %p2818_p10 = por %p2817_p8, %p2816_p2 }
  0x6e   : > { %p2819_p0 = pnand %p2818_p10, %p2812_p13 }
  0x70   : > { %2822 = shalt.err (!%p2819_p0)
}
  0x71   : > { %s2907_s22 = smov 512   ;;  %s3392_s10 = smov 8  }
  0x72   : > { %s3393_s24 = smov 128   ;;  %p3394_p5 = scmp.ne.s32.totalorder %s3387_s26, 0 }
  0x73   : > { %2625 = dma.hbm_to_vmem [thread:$0]  (!%p3391_p12), %s3076_s8, 256, %s3078_s11, %s3080_s29, %s2907_s22, %s3393_s24, %s3392_s10  }
  0x74   : > { %209 = sbr.rel (%p3394_p5) target bundleno = 2232 (0x8b8), region = 36  ;;  %s211_s5 = sand.u32 (!%p3394_p5), 1, %s2887_s16  }
  0x75   : > { %s3113_s9 = sshll.u32 (!%p3394_p5), %s211_s5, 4  ;;  %s212_s12 = scalar_lea.sflag (!%p3394_p5), [#allocation4], %s211_s5 }
  0x76   : > { %s215_s18 = scalar_lea.vmem (!%p3394_p5), [#allocation3], %s3113_s9  ;;  %p3395_p9 = scmp.ne.s32.totalorder (!%p3394_p5), %s3386_s25, 0 }
  0x7b   : > { %2866 = dma.done.wait (%p3395_p9), %s212_s12, 256  }
  0x7c   : > { %2868 = vsyncadd (%p3395_p9), %s212_s12, 4294967040  ;;  %p3396_p1 = scmp.eq.s32.totalorder %s2960_s19, 0 }
  0x7e   : > { %2870 = dma.done.wait (%p3396_p1), [#allocation7], 4096   ;;  %p3397_p12 = pmov %p3396_p1 }
  0x7f   : > { %p3398_p3 = pmov %p3396_p1 }
  0x80   : > { %2872 = vsyncadd (%p3397_p12), [#allocation7], 4294963200 }
  0x81   : > { %2874 = dma.done.wait (%p3398_p3), [#allocation10], 4096   ;;  %p3399_p4 = pmov %p3396_p1 }
  0x82   : > { %p3400_p6 = scmp.ne.s32.totalorder %s2960_s19, 0 }
  0x83   : > { %2876 = vsyncadd (%p3399_p4), [#allocation10], 4294963200  ;;  %vm251_vm0 = vcmask (!%p3400_p6), 261120   ;;  %v255_v0 = vld [vmem:[#allocation6] sm:$0xff] (!%p3400_p6)  ;;  %v256_v1 = vld [vmem:[#allocation6 + $0x8] sm:$0xff] (!%p3400_p6)  ;;  %v2908_v3 = vmov (!%p3400_p6), 0.0  }
  0x84   : > { %250 = sbr.rel (%p3400_p6) target bundleno = 150 (0x96), region = 56  ;;  %v257_v2 = vld [vmem:[#allocation6 + $0x10] sm:$0xff] (!%p3400_p6)  ;;  %254 = vst.msk [vmem:[#allocation2 + $0x10] sm:$0xff] (!%p3400_p6), %vm251_vm0, %v2908_v3  ;;  %252 = vst.msk [vmem:[#allocation2] sm:$0xff] (!%p3400_p6), %vm251_vm0, %v2908_v3  ;;  %v258_v4 = vld [vmem:[#allocation6 + $0x18] sm:$0xff] (!%p3400_p6)  ;;  %v259_v5 = vsel (!%p3400_p6), %vm251_vm0, %v255_v0, 0.0 }
  0x85   : > { %253 = vst.msk [vmem:[#allocation2 + $0x8] sm:$0xff] (!%p3400_p6), %vm251_vm0, %v2908_v3  ;;  %v266_v6 = vsel (!%p3400_p6), %vm251_vm0, %v256_v1, 0.0  ;;  %v273_v7 = vsel (!%p3400_p6), %vm251_vm0, %v257_v2, 0.0  ;;  %v260_v8 = vrot.slane (!%p3400_p6), %v259_v5, 4  ;;  %v280_v11 = vsel (!%p3400_p6), %vm251_vm0, %v258_v4, 0.0 }
  0x86   : > { %v267_v9 = vrot.slane (!%p3400_p6), %v266_v6, 4  ;;  %v274_v10 = vrot.slane (!%p3400_p6), %v273_v7, 4  ;;  %v281_v12 = vrot.slane (!%p3400_p6), %v280_v11, 4  ;;  %vm291_vm1 = vcmask (!%p3400_p6), 1041409  }
  0x87   : > { %v261_v13 = vadd.f32 (!%p3400_p6), %v260_v8, %v259_v5  ;;  %vm293_vm2 = vcmask (!%p3400_p6), 1042434   ;;  %vm295_vm3 = vcmask (!%p3400_p6), 1043459   ;;  %vm298_vm4 = vcmask (!%p3400_p6), 257024  }
  0x88   : > { %v268_v14 = vadd.f32 (!%p3400_p6), %v267_v9, %v266_v6  ;;  %v275_v15 = vadd.f32 (!%p3400_p6), %v274_v10, %v273_v7  ;;  %v282_v16 = vadd.f32 (!%p3400_p6), %v281_v12, %v280_v11 }
  0x89   : > { %v262_v17 = vrot.slane (!%p3400_p6), %v261_v13, 2 }
  0x8a   : > { %v269_v18 = vrot.slane (!%p3400_p6), %v268_v14, 2  ;;  %v276_v19 = vrot.slane (!%p3400_p6), %v275_v15, 2  ;;  %v283_v20 = vrot.slane (!%p3400_p6), %v282_v16, 2 }
  0x8b   : > { %v263_v21 = vadd.f32 %v262_v17, %v261_v13 }
  0x8c   : > { %v270_v22 = vadd.f32 %v269_v18, %v268_v14  ;;  %v277_v23 = vadd.f32 %v276_v19, %v275_v15  ;;  %v284_v24 = vadd.f32 %v283_v20, %v282_v16 }
  0x8d   : > { %v264_v25 = vrot.slane %v263_v21, 1 }
  0x8e   : > { %v271_v26 = vrot.slane %v270_v22, 1  ;;  %v278_v27 = vrot.slane %v277_v23, 1  ;;  %v285_v28 = vrot.slane %v284_v24, 1 }
  0x8f   : > { %v265_v29 = vadd.f32 %v264_v25, %v263_v21 }
  0x90   : > { %v272_v30 = vadd.f32 %v271_v26, %v270_v22  ;;  %v279_v31 = vadd.f32 %v278_v27, %v277_v23  ;;  %v286_v32 = vadd.f32 %v285_v28, %v284_v24 }
  0x92   : > { %v292_v33 = vsel %vm291_vm1, %v272_v30, %v265_v29 }
  0x93   : > { %v294_v34 = vsel %vm293_vm2, %v279_v31, %v292_v33 }
  0x94   : > { %v296_v35 = vsel %vm295_vm3, %v286_v32, %v294_v34 }
  0x95   : > { %299 = vst.msk [vmem:[#allocation2 + $0x10] sm:$0xf] %vm298_vm4, %v296_v35 }
  0x96 PF: > { %v300_v36 = vld [vmem:[#allocation2] sm:$0xff]  ;;  %v302_v37 = vld [vmem:[%s215_s18] sm:$0xff]  ;;  %vm306_vm5 = vcmask 261120   ;;  %p2129_p7 = scmp.ne.s32.totalorder %s2960_s19, 3 }
  0x97   : > { %v301_v38 = vld [vmem:[#allocation2 + $0x8] sm:$0xff]  ;;  %v304_v39 = vadd.f32 %v302_v37, %v300_v36  ;;  %v303_v40 = vld [vmem:[%s215_s18 + $0x8] sm:$0xff]  ;;  %v340_v48 = vld [vmem:[#allocation8 + $0xc0] sm:$0xff] (!%p2129_p7)  ;;  %v2909_v49 = vmov (!%p2129_p7), 0.0   ;;  %v2910_v9 = vmov (!%p2129_p7), 0.0|0.0   ;;  %vm2911_vm6 = vmmov (!%p2129_p7), 0  }
  0x98   : > { %v305_v41 = vadd.f32 %v303_v40, %v301_v38  ;;  %312 = sbr.rel (%p2129_p7) target bundleno = 2206 (0x89e), region = 60  ;;  %v319_v42 = vld [vmem:[#allocation8 + $0x18] sm:$0xff] (!%p2129_p7)  ;;  %v326_v43 = vld [vmem:[#allocation8 + $0x50] sm:$0xff] (!%p2129_p7)  ;;  %v325_v46 = vld [vmem:[#allocation8 + $0x48] sm:$0xff] (!%p2129_p7)  ;;  %498 = vmatprep.mubr.f32.mxu1 (!%p2129_p7), %v2909_v49  ;;  %417 = vmatprep.mubr.f32.mxu0 (!%p2129_p7), %v2909_v49  ;;  %v2912_v35 = vmov (!%p2129_p7), 1983009808   ;;  %v678_v37 = vlaneseq (!%p2129_p7) }
  0x99   : > { %307 = vst.msk [vmem:[#allocation2] sm:$0xff] %vm306_vm5, %v304_v39  ;;  %v318_v44 = vld [vmem:[#allocation8 + $0x10] sm:$0xff] (!%p2129_p7)  ;;  %v2476_v45 = vpack.c.bf16 (!%p2129_p7), %v326_v43, %v319_v42  ;;  %v333_v47 = vld [vmem:[#allocation8 + $0x88] sm:$0xff] (!%p2129_p7)  ;;  %v332_v52 = vld [vmem:[#allocation8 + $0x80] sm:$0xff] (!%p2129_p7)  ;;  %v676_v36 = vunpack.c.l.s4 (!%p2129_p7), %v2912_v35  ;;  %vm857_vm7 = vcmask (!%p2129_p7), 58368   ;;  %vm879_vm8 = vcmask (!%p2129_p7), 64512  }
  0x9a   : > { %308 = vst.msk [vmem:[#allocation2 + $0x8] sm:$0xff] %vm306_vm5, %v305_v41  ;;  %v2478_v50 = vpack.c.bf16 (!%p2129_p7), %v325_v46, %v318_v44  ;;  %v2480_v51 = vpack.c.bf16 (!%p2129_p7), %v340_v48, %v333_v47  ;;  %v339_v53 = vld [vmem:[#allocation8 + $0xb8] sm:$0xff] (!%p2129_p7)  ;;  %v317_v54 = vld [vmem:[#allocation8 + $0x8] sm:$0xff] (!%p2129_p7)  ;;  %v324_v55 = vld [vmem:[#allocation8 + $0x40] sm:$0xff] (!%p2129_p7)  ;;  %v679_v43 = vshrl.u32 (!%p2129_p7), %v678_v37, 7  ;;  %vm2003_vm9 = vcmask (!%p2129_p7), 1041408  }
  0x9b   : > { %2477 = vmatprep.subr.bf16.mxu1 (!%p2129_p7), %v2476_v45  ;;  %v316_v56 = vld [vmem:[#allocation8] sm:$0xff] (!%p2129_p7)  ;;  %v2482_v57 = vpack.c.bf16 (!%p2129_p7), %v339_v53, %v332_v52  ;;  %v2468_v58 = vpack.c.bf16 (!%p2129_p7), %v324_v55, %v317_v54  ;;  %v323_v59 = vld [vmem:[#allocation8 + $0x38] sm:$0xff] (!%p2129_p7)  ;;  %v322_v60 = vld [vmem:[#allocation8 + $0x30] sm:$0xff] (!%p2129_p7)  ;;  %v677_v42 = vunpack.c.0.s8 (!%p2129_p7), %v676_v36 }
  0x9c   : > { %2479 = vmatpush1.bf16.msra.mxu1 (!%p2129_p7), %v2478_v50  ;;  %v2470_v61 = vpack.c.bf16 (!%p2129_p7), %v323_v59, %v316_v56  ;;  %v329_v62 = vld [vmem:[#allocation8 + $0x68] sm:$0xff] (!%p2129_p7)  ;;  %v331_v63 = vld [vmem:[#allocation8 + $0x78] sm:$0xff] (!%p2129_p7)  ;;  %v338_v0 = vld [vmem:[#allocation8 + $0xb0] sm:$0xff] (!%p2129_p7) }
  0x9d   : > { %2481 = vmatprep.subr.bf16.mxu1 (!%p2129_p7), %v2480_v51  ;;  %2469 = vmatprep.subr.bf16.mxu0 (!%p2129_p7), %v2468_v58  ;;  %v2472_v1 = vpack.c.bf16 (!%p2129_p7), %v338_v0, %v331_v63  ;;  %v330_v2 = vld [vmem:[#allocation8 + $0x70] sm:$0xff] (!%p2129_p7)  ;;  %v337_v3 = vld [vmem:[#allocation8 + $0xa8] sm:$0xff] (!%p2129_p7)  ;;  %v2493_v7 = vpack.c.bf16 (!%p2129_p7), %v329_v62, %v322_v60  ;;  %v328_v8 = vld [vmem:[#allocation8 + $0x60] sm:$0xff] (!%p2129_p7)  ;;  %v3182_v46 = vsub.s32 (!%p2129_p7), %v677_v42, %v679_v43 }
  0x9e   : > { %2471 = vmatpush1.bf16.msra.mxu0 (!%p2129_p7), %v2470_v61  ;;  %v2474_v4 = vpack.c.bf16 (!%p2129_p7), %v337_v3, %v330_v2  ;;  %v321_v5 = vld [vmem:[#allocation8 + $0x28] sm:$0xff] (!%p2129_p7)  ;;  %v336_v10 = vld [vmem:[#allocation8 + $0xa0] sm:$0xff] (!%p2129_p7)  ;;  %v343_v11 = vld [vmem:[#allocation8 + $0xd8] sm:$0xff] (!%p2129_p7) }
  0x9f   : > { %2473 = vmatprep.subr.bf16.mxu0 %v2472_v1  ;;  %v2484_v12 = vpack.c.bf16 %v328_v8, %v321_v5  ;;  %v320_v13 = vld [vmem:[#allocation8 + $0x20] sm:$0xff]  ;;  %v327_v14 = vld [vmem:[#allocation8 + $0x58] sm:$0xff]  ;;  %v2496_v16 = vpack.c.bf16 %v343_v11, %v336_v10  ;;  %v342_v20 = vld [vmem:[#allocation8 + $0xd0] sm:$0xff] }
  0xa0   : > { %2483 = vmatpush1.bf16.msra.mxu1 %v2482_v57  ;;  %v313_v6 = vld [vmem:[#allocation2] sm:$0xff]  ;;  %v2486_v17 = vpack.c.bf16 %v327_v14, %v320_v13  ;;  %v315_v18 = vld [vmem:[#allocation2 + $0x10] sm:$0xff]  ;;  %v334_v22 = vld [vmem:[#allocation8 + $0x90] sm:$0xff] }
  0xa1   : > { %2492 = vmatprep.subr.bf16.mxu1 %v2910_v9  ;;  %v314_v15 = vld [vmem:[#allocation2 + $0x8] sm:$0xff]  ;;  %v335_v19 = vld [vmem:[#allocation8 + $0x98] sm:$0xff]  ;;  %v341_v23 = vld [vmem:[#allocation8 + $0xc8] sm:$0xff] }
  0xa2   : > { %2475 = vmatpush1.bf16.msra.mxu0 %v2474_v4  ;;  %v2488_v21 = vpack.c.bf16 %v342_v20, %v335_v19  ;;  %v2490_v24 = vpack.c.bf16 %v341_v23, %v334_v22  ;;  %v687_v23 = vld [vmem:[#allocation9 + $0x20] sm:$0xff]  ;;  %v694_v36 = vld [vmem:[#allocation9 + $0x90] sm:$0xff] }
  0xa3   : > { %2133 = vmatmul.mubr.msk.f32.vlgmr.msra.gmra.mrb[0].mxu1 %vm306_vm5, %v313_v6  ;;  %2485 = vmatprep.subr.bf16.mxu0 %v2484_v12  ;;  %v693_v35 = vld [vmem:[#allocation9 + $0x80] sm:$0xff]  ;;  %v698_v42 = vld [vmem:[#allocation9 + $0xd0] sm:$0xff] }
  0xa4   : > { %2494 = vmatpush3.bf16.msra.mxu1 %v2493_v7  ;;  %504 = vmatprep.mubr.f32.mxu1 %v2909_v49  ;;  %v3229_v37 = vpack.c.bf16 %v694_v36, %v693_v35 }
  0xa5   : > { %2495 = vmatprep.subr.bf16.mxu1 %v2910_v9  ;;  %2130 = vmatmul.mubr.msk.f32.vlgmr.msra.gmra.mrb[0].mxu0 %vm306_vm5, %v313_v6 }
  0xa6   : > { %423 = vmatprep.mubr.f32.mxu0 %v2909_v49  ;;  %2487 = vmatpush1.bf16.msra.mxu0 %v2486_v17  ;;  %v685_v17 = vld [vmem:[#allocation9] sm:$0xff] }
  0xa7   : > { %2134 = vmatmul.mubr.msk.f32.gmra.mrb[2].mxu1 %vm306_vm5, %v314_v15  ;;  %2489 = vmatprep.subr.bf16.mxu0 %v2488_v21 }
  0xa8   : > { %510 = vmatprep.mubr.f32.mxu1 %v2909_v49  ;;  %2497 = vmatpush3.bf16.msra.mxu1 %v2496_v16 }
  0xa9   : > { %2273 = vmatprep.subr.mxu1 %v2909_v49  ;;  %2131 = vmatmul.mubr.msk.f32.gmra.mrb[2].mxu0 %vm306_vm5, %v314_v15 }
  0xaa   : > { %429 = vmatprep.mubr.f32.mxu0 %v2909_v49  ;;  %2491 = vmatpush1.bf16.msra.mxu0 %v2490_v24  ;;  %v688_v24 = vld [vmem:[#allocation9 + $0x30] sm:$0xff] }
  0xab   : > { %2135 = vmatmul.mubr.msk.f32.gmra.mrb[4].mxu1 %vm306_vm5, %v315_v18  ;;  %2268 = vmatprep.subr.mxu0 %v2909_v49 }
  0xac   : > { %2259 = vmatprep.mubr.msk.f32.mxu1 %vm2911_vm6, %v2909_v49 }
  0xad   : > { %2132 = vmatmul.mubr.msk.f32.gmra.mrb[4].mxu0 %vm306_vm5, %v315_v18 }
  0xae   : > { %579 = vmatprep.mubr.f32.mxu0 %v2909_v49 }
  0xaf   : > { %2260 = vmatmul.mubr.msk.f32.vlgmr.msra.gmra.mrb[6].mxu1 %vm306_vm5, %v313_v6 }
  0xb0   : > { %2262 = vmatprep.mubr.msk.f32.mxu1 %vm2911_vm6, %v2909_v49 }
  0xb1   : > { %2136 = vmatmul.mubr.msk.f32.vlgmr.msra.gmra.mrb[6].mxu0 %vm306_vm5, %v313_v6 }
  0xb2   : > { %585 = vmatprep.mubr.f32.mxu0 %v2909_v49 }
  0xb3   : > { %2263 = vmatmul.mubr.msk.f32.gmra.mrb[8].mxu1 %vm306_vm5, %v314_v15 }
  0xb4   : > { %2265 = vmatprep.mubr.msk.f32.mxu1 %vm2911_vm6, %v2909_v49 }
  0xb5   : > { %2137 = vmatmul.mubr.msk.f32.gmra.mrb[8].mxu0 %vm306_vm5, %v314_v15 }
  0xb6   : > { %591 = vmatprep.mubr.f32.mxu0 %v2909_v49 }
  0xb7   : > { %2266 = vmatmul.mubr.msk.f32.gmra.mrb[10].mxu1 %vm306_vm5, %v315_v18 }
  0xb8   : > { %2275 = vmatprep.mubr.msk.f32.mxu1 %vm2911_vm6, %v2909_v49 }
  0xb9   : > { %2138 = vmatmul.mubr.msk.f32.gmra.mrb[10].mxu0 %vm306_vm5, %v315_v18  ;;  %v686_v18 = vld [vmem:[#allocation9 + $0x10] sm:$0xff] }
  0xba   : > { %2270 = vmatprep.mubr.msk.f32.mxu0 %vm2911_vm6, %v2909_v49  ;;  %v3206_v20 = vpack.c.bf16 %v686_v18, %v685_v17 }
 0x176   : > { %v3172_v25 = vpop.f32.mrb[0].mxu1 }
 0x177   : > { %v3174_v26 = vpop.f32.mrb[1].mxu1 }
 0x178   : > { %v419_v27 = vpop.f32.mrb[0].mxu0 }
 0x179   : > { %v421_v29 = vpop.f32.mrb[1].mxu0  ;;  %2269 = vmatpush3.xpose.msra.mxu0 %v419_v27  ;;  %v3212_v27 = vpack.c.bf16 %v688_v24, %v687_v23 }
 0x17a   : > { %v3176_v28 = vpop.f32.mrb[2].mxu1  ;;  %2278 = vmatprep.subr.mxu0 %v2909_v49 }
 0x17b   : > { %v3178_v30 = vpop.f32.mrb[3].mxu1 }
 0x17c   : > { %v425_v31 = vpop.f32.mrb[2].mxu0 }
 0x17d   : > { %v427_v33 = vpop.f32.mrb[3].mxu0  ;;  %2274 = vmatpush3.xpose.msra.mxu1 %v425_v31  ;;  %v690_v31 = vld [vmem:[#allocation9 + $0x50] sm:$0xff] }
 0x17e   : > { %v512_v32 = vpop.f32.mrb[4].mxu1  ;;  %2283 = vmatprep.subr.mxu1 %v2909_v49 }
 0x17f   : > { %v513_v34 = vpop.f32.mrb[5].mxu1 }
 0x180   : > { %v431_v38 = vpop.f32.mrb[4].mxu0 }
 0x181   : > { %v432_v40 = vpop.f32.mrb[5].mxu0  ;;  %v695_v38 = vld [vmem:[#allocation9 + $0xa0] sm:$0xff] }
 0x182   : > { %v662_v39 = vpop.f32.mrb[6].mxu1 }
 0x183   : > { %v2261_v41 = vpop.f32.mrb[7].mxu1  ;;  %v696_v39 = vld [vmem:[#allocation9 + $0xb0] sm:$0xff] }
 0x184   : > { %v3194_v52 = vpop.f32.mrb[6].mxu0  ;;  %v3233_v40 = vpack.c.bf16 %v696_v39, %v695_v38  ;;  %v697_v41 = vld [vmem:[#allocation9 + $0xc0] sm:$0xff] }
 0x185   : > { %v3196_v53 = vpop.f32.mrb[7].mxu0  ;;  %v3237_v43 = vpack.c.bf16 %v698_v42, %v697_v41 }
 0x186   : > { %v666_v44 = vpop.f32.mrb[8].mxu1 }
 0x187   : > { %v2264_v45 = vpop.f32.mrb[9].mxu1  ;;  %v699_v44 = vld [vmem:[#allocation9 + $0xe0] sm:$0xff] }
 0x188   : > { %v3198_v54 = vpop.f32.mrb[8].mxu0  ;;  %v700_v45 = vld [vmem:[#allocation9 + $0xf0] sm:$0xff] }
 0x189   : > { %v3200_v55 = vpop.f32.mrb[9].mxu0 }
 0x18a   : > { %v3184_v47 = vpop.f32.mrb[10].mxu1 }
 0x18b   : > { %v681_v48 = vrot.slane %v3184_v47, %v3182_v46  ;;  %v2267_v50 = vpop.f32.mrb[11].mxu1 }
 0x18c   : > { %v593_v56 = vpop.f32.mrb[10].mxu0 }
 0x18d   : > { %v682_v51 = vcombine.high %v681_v48, %v681_v48  ;;  %2271 = vmatmul.mubr.f32.vlgmr.msra.gmra.mrb[12].mxu0 %v681_v48  ;;  %v594_v57 = vpop.f32.mrb[11].mxu0  ;;  %v3241_v48 = vpack.c.bf16 %v700_v45, %v699_v44 }
 0x18e   : > { %2279 = vmatpush3.msra.mxu0 %v421_v29  ;;  %2280 = vmatprep.mubr.msk.f32.mxu0 %vm2911_vm6, %v2909_v49  ;;  %v689_v29 = vld [vmem:[#allocation9 + $0x40] sm:$0xff] }
 0x18f   : > { %2276 = vmatmul.mubr.f32.vlgmr.msra.gmra.mrb[12].mxu1 %v682_v51  ;;  %2498 = vmatprep.subr.bf16.mxu0 %v2910_v9  ;;  %v3221_v32 = vpack.c.bf16 %v690_v31, %v689_v29 }
 0x190   : > { %2284 = vmatpush3.msra.mxu1 %v427_v33  ;;  %2285 = vmatprep.mubr.msk.f32.mxu1 %vm2911_vm6, %v2909_v49  ;;  %v692_v33 = vld [vmem:[#allocation9 + $0x70] sm:$0xff] }
 0x191   : > { %2323 = vmatprep.subr.mxu1 %v2909_v49 }
 0x260   : > { %v783_v58 = vpop.f32.mrb[12].mxu0 }
 0x261   : > { %v2272_v59 = vpop.f32.mrb[13].mxu0  ;;  %v858_v61 = vsel %vm857_vm7, %v783_v58, -inf }
 0x262   : > { %v853_v60 = vpop.f32.mrb[12].mxu1 }
 0x263   : > { %v859_v62 = vsel %vm857_vm7, %v853_v60, -inf  ;;  %v2277_v63 = vpop.f32.mrb[13].mxu1 }
 0x264   : > { %v860_v0 = vmax.f32 %v858_v61, %v859_v62 }
 0x266   : > { %v861_v1 = vsub.f32 %v783_v58, %v860_v0  ;;  %v862_v2 = vsub.f32 %v853_v60, %v860_v0 }
 0x268   : > { %v863_v3 = vmul.f32 1.442695, %v861_v1  ;;  %v865_v4 = vmul.f32 1.442695, %v862_v2 }
 0x26a   : > { %2685 = vpow2.f32 %v863_v3 }
 0x26b   : > { %2687 = vpow2.f32 %v865_v4 }
 0x274   : > { %v2686_v5 = vpop.eup %2685 }
 0x275   : > { %v2688_v6 = vpop.eup %2687  ;;  %v867_v7 = vsel %vm857_vm7, %v2686_v5, 0.0 }
 0x276   : > { %v868_v8 = vsel %vm857_vm7, %v2688_v6, 0.0 }
 0x277   : > { %v869_v10 = vadd.f32 %v868_v8, %v867_v7 }
 0x279   : > { %2689 = vrcp.f32 %v869_v10 }
 0x283   : > { %v2690_v11 = vpop.eup %2689 }
 0x284   : > { %v871_v12 = vmul.f32 %v2690_v11, %v869_v10 }
 0x286   : > { %v872_v13 = vsub.f32 2.0, %v871_v12 }
 0x288   : > { %v873_v14 = vmul.f32 %v2690_v11, %v872_v13 }
 0x28a   : > { %v874_v15 = vmul.f32 %v873_v14, %v869_v10 }
 0x28c   : > { %v875_v16 = vsub.f32 2.0, %v874_v15 }
 0x28e   : > { %v876_v19 = vmul.f32 %v875_v16, %v873_v14 }
 0x290   : > { %v877_v21 = vmul.f32 %v2686_v5, %v876_v19  ;;  %v878_v22 = vmul.f32 %v2688_v6, %v876_v19 }
 0x292   : > { %2281 = vmatmul.mubr.msk.f32.vlgmr.msra.gmra.mrb[14].mxu0 %vm879_vm8, %v877_v21  ;;  %2286 = vmatmul.mubr.msk.f32.vlgmr.msra.gmra.mrb[14].mxu1 %vm879_vm8, %v878_v22 }
 0x293   : > { %2500 = vmatpush3.bf16.msra.mxu0 %v3206_v20  ;;  %2324 = vmatpush3.xpose.msra.mxu1 %v3172_v25  ;;  %v691_v25 = vld [vmem:[#allocation9 + $0x60] sm:$0xff] }
 0x294   : > { %2501 = vmatprep.subr.bf16.mxu0 %v2910_v9  ;;  %2320 = vmatprep.mubr.msk.f32.mxu0 %vm2911_vm6, %v2909_v49  ;;  %v3225_v34 = vpack.c.bf16 %v692_v33, %v691_v25 }
 0x295   : > { %2325 = vmatprep.mubr.msk.f32.mxu1 %vm2911_vm6, %v2909_v49  ;;  %2328 = vmatprep.subr.mxu1 %v2909_v49 }
 0x297   : > { %2503 = vmatpush3.bf16.msra.mxu0 %v3212_v27 }
 0x298   : > { %2504 = vmatprep.subr.bf16.mxu0 %v2910_v9 }
 0x29b   : > { %2506 = vmatpush3.bf16.msra.mxu0 %v3221_v32 }
 0x29c   : > { %2507 = vmatprep.subr.bf16.mxu0 %v2910_v9 }
 0x29f   : > { %2509 = vmatpush3.bf16.msra.mxu0 %v3225_v34 }
 0x2a0   : > { %2510 = vmatprep.subr.bf16.mxu0 %v2910_v9 }
 0x2a3   : > { %2512 = vmatpush3.bf16.msra.mxu0 %v3229_v37 }
 0x2a4   : > { %2513 = vmatprep.subr.bf16.mxu0 %v2910_v9 }
 0x2a7   : > { %2515 = vmatpush3.bf16.msra.mxu0 %v3233_v40 }
 0x2a8   : > { %2516 = vmatprep.subr.bf16.mxu0 %v2910_v9 }
 0x2ab   : > { %2518 = vmatpush3.bf16.msra.mxu0 %v3237_v43 }
 0x2ac   : > { %2519 = vmatprep.subr.bf16.mxu0 %v2910_v9 }
 0x2af   : > { %2521 = vmatpush3.bf16.msra.mxu0 %v3241_v48 }
 0x2b0   : > { %2378 = vmatprep.subr.mxu0 %v2909_v49 }
 0x2b2   : > { %2321 = vmatmul.mubr.f32.vlgmr.msra.gmra.mrb[16].mxu0 %v3184_v47 }
 0x2b3   : > { %2380 = vmatprep.mubr.msk.f32.mxu0 %vm2911_vm6, %v2909_v49 }
 0x2b8   : > { %2379 = vmatpush3.xpose.msra.mxu0 %v3194_v52 }
 0x2b9   : > { %2383 = vmatprep.subr.mxu0 %v2909_v49 }
 0x365   : > { %v949_v50 = vpop.f32.mrb[14].mxu0  ;;  %v1022_v51 = vpop.f32.mrb[14].mxu1 }
 0x366   : > { %v2282_v56 = vpop.f32.mrb[15].mxu0  ;;  %v2287_v57 = vpop.f32.mrb[15].mxu1 }
 0x385   : > { %v1092_v58 = vpop.f32.mrb[16].mxu0 }
 0x386   : > { %v1103_v59 = vrot.slane %v1092_v58, %v3182_v46  ;;  %v2322_v60 = vpop.f32.mrb[17].mxu0 }
 0x388   : > { %v1104_v61 = vcombine.high %v1103_v59, %v1103_v59  ;;  %v1107_v62 = vadd.f32 %v1103_v59, %v949_v50 }
 0x38a   : > { %v1108_v63 = vadd.f32 %v1104_v61, %v1022_v51  ;;  %2326 = vmatmul.mubr.f32.vlgmr.msra.gmra.mrb[16].mxu1 %v1107_v62 }
 0x38b   : > { %2329 = vmatpush3.xpose.msra.mxu1 %v3176_v28  ;;  %2330 = vmatprep.mubr.msk.f32.mxu1 %vm2911_vm6, %v2909_v49 }
 0x38c   : > { %v1418_v47 = vcombine.low %v1107_v62, %v1108_v63  ;;  %2333 = vmatprep.subr.mxu1 %v2909_v49 }
 0x38e   : > { %2331 = vmatmul.mubr.f32.vlgmr.msra.gmra.mrb[18].mxu1 %v1108_v63 }
 0x38f   : > { %2334 = vmatpush3.msra.mxu1 %v3174_v26  ;;  %2335 = vmatprep.mubr.msk.f32.mxu1 %vm2911_vm6, %v2909_v49 }
 0x390   : > { %2338 = vmatprep.subr.mxu1 %v2909_v49 }
 0x45d   : > { %v1175_v52 = vpop.f32.mrb[16].mxu1 }
 0x45e   : > { %v2327_v0 = vpop.f32.mrb[17].mxu1  ;;  %v1249_v2 = vsel %vm857_vm7, %v1175_v52, -inf }
 0x461   : > { %v1245_v1 = vpop.f32.mrb[18].mxu1 }
 0x462   : > { %v1250_v28 = vsel %vm857_vm7, %v1245_v1, -inf  ;;  %v2332_v3 = vpop.f32.mrb[19].mxu1 }
 0x463   : > { %v1251_v4 = vmax.f32 %v1249_v2, %v1250_v28 }
 0x465   : > { %v1252_v5 = vsub.f32 %v1175_v52, %v1251_v4  ;;  %v1253_v6 = vsub.f32 %v1245_v1, %v1251_v4 }
 0x467   : > { %v1254_v7 = vmul.f32 1.442695, %v1252_v5  ;;  %v1256_v8 = vmul.f32 1.442695, %v1253_v6 }
 0x469   : > { %2691 = vpow2.f32 %v1254_v7 }
 0x46a   : > { %2693 = vpow2.f32 %v1256_v8  ;;  %v706_v8 = vld [vmem:[#allocation9 + $0x58] sm:$0xff] }
 0x473   : > { %v2692_v26 = vpop.eup %2691 }
 0x474   : > { %v2694_v10 = vpop.eup %2693  ;;  %v1258_v11 = vsel %vm857_vm7, %v2692_v26, 0.0 }
 0x475   : > { %v1259_v12 = vsel %vm857_vm7, %v2694_v10, 0.0 }
 0x476   : > { %v1260_v13 = vadd.f32 %v1259_v12, %v1258_v11  ;;  %v709_v11 = vld [vmem:[#allocation9 + $0x88] sm:$0xff]  ;;  %v710_v12 = vld [vmem:[#allocation9 + $0x98] sm:$0xff] }
 0x478   : > { %2695 = vrcp.f32 %v1260_v13 }
 0x482   : > { %v2696_v14 = vpop.eup %2695 }
 0x483   : > { %v1262_v15 = vmul.f32 %v2696_v14, %v1260_v13 }
 0x485   : > { %v1263_v16 = vsub.f32 2.0, %v1262_v15  ;;  %v712_v15 = vld [vmem:[#allocation9 + $0xb8] sm:$0xff] }
 0x487   : > { %v1264_v17 = vmul.f32 %v2696_v14, %v1263_v16  ;;  %v711_v14 = vld [vmem:[#allocation9 + $0xa8] sm:$0xff] }
 0x488   : > { %v2586_v16 = vpack.c.bf16 %v712_v15, %v711_v14 }
 0x489   : > { %v1265_v18 = vmul.f32 %v1264_v17, %v1260_v13  ;;  %v2583_v13 = vpack.c.bf16 %v710_v12, %v709_v11 }
 0x48b   : > { %v1266_v19 = vsub.f32 2.0, %v1265_v18  ;;  %v714_v18 = vld [vmem:[#allocation9 + $0xd8] sm:$0xff] }
 0x48d   : > { %v1267_v21 = vmul.f32 %v1266_v19, %v1264_v17  ;;  %v713_v17 = vld [vmem:[#allocation9 + $0xc8] sm:$0xff] }
 0x48e   : > { %v2589_v19 = vpack.c.bf16 %v714_v18, %v713_v17 }
 0x48f   : > { %v1268_v22 = vmul.f32 %v2692_v26, %v1267_v21  ;;  %v1269_v23 = vmul.f32 %v2694_v10, %v1267_v21  ;;  %v707_v26 = vld [vmem:[#allocation9 + $0x68] sm:$0xff] }
 0x490   : > { %v715_v21 = vld [vmem:[#allocation9 + $0xe8] sm:$0xff] }
 0x491   : > { %2336 = vmatmul.mubr.msk.f32.vlgmr.msra.gmra.mrb[20].mxu1 %vm879_vm8, %v1268_v22  ;;  %v716_v22 = vld [vmem:[#allocation9 + $0xf8] sm:$0xff] }
 0x492   : > { %2339 = vmatpush3.msra.mxu1 %v3178_v30  ;;  %2340 = vmatprep.mubr.msk.f32.mxu1 %vm2911_vm6, %v2909_v49  ;;  %v1425_v30 = vrot.slane %v1418_v47, %v3182_v46 }
 0x493   : > { %2522 = vmatprep.subr.bf16.mxu1 %v2910_v9 }
 0x495   : > { %2341 = vmatmul.mubr.msk.f32.vlgmr.msra.gmra.mrb[22].mxu1 %vm879_vm8, %v1269_v23  ;;  %v2592_v23 = vpack.c.bf16 %v716_v22, %v715_v21 }
 0x496   : > { %2524 = vmatpush3.bf16.msra.mxu1 %v3206_v20  ;;  %2375 = vmatprep.mubr.msk.f32.mxu1 %vm2911_vm6, %v2909_v49 }
 0x497   : > { %2525 = vmatprep.subr.bf16.mxu1 %v2910_v9 }
 0x49a   : > { %2527 = vmatpush3.bf16.msra.mxu1 %v3212_v27 }
 0x49b   : > { %2528 = vmatprep.subr.bf16.mxu1 %v2910_v9 }
 0x49e   : > { %2530 = vmatpush3.bf16.msra.mxu1 %v3221_v32 }
 0x49f   : > { %2531 = vmatprep.subr.bf16.mxu1 %v2910_v9 }
 0x4a2   : > { %2533 = vmatpush3.bf16.msra.mxu1 %v3225_v34 }
 0x4a3   : > { %2534 = vmatprep.subr.bf16.mxu1 %v2910_v9 }
 0x4a6   : > { %2536 = vmatpush3.bf16.msra.mxu1 %v3229_v37 }
 0x4a7   : > { %2537 = vmatprep.subr.bf16.mxu1 %v2910_v9 }
 0x4aa   : > { %2539 = vmatpush3.bf16.msra.mxu1 %v3233_v40 }
 0x4ab   : > { %2540 = vmatprep.subr.bf16.mxu1 %v2910_v9 }
 0x4ae   : > { %2542 = vmatpush3.bf16.msra.mxu1 %v3237_v43 }
 0x4af   : > { %2543 = vmatprep.subr.bf16.mxu1 %v2910_v9 }
 0x4b2   : > { %2545 = vmatpush3.bf16.msra.mxu1 %v3241_v48 }
 0x4b3   : > { %2570 = vmatprep.subr.bf16.mxu1 %v2910_v9 }
 0x4b5   : > { %2376 = vmatmul.mubr.f32.vlgmr.msra.gmra.mrb[24].mxu1 %v1425_v30 }
 0x4b6   : > { %2465 = vmatprep.mubr.msk.f32.mxu1 %vm2911_vm6, %v2909_v49 }
 0x564   : > { %v1339_v24 = vpop.f32.mrb[20].mxu1 }
 0x565   : > { %v2337_v29 = vpop.f32.mrb[21].mxu1 }
 0x568   : > { %v1412_v31 = vpop.f32.mrb[22].mxu1 }
 0x569   : > { %v2342_v25 = vpop.f32.mrb[23].mxu1 }
 0x588   : > { %v1493_v33 = vpop.f32.mrb[24].mxu1 }
 0x589   : > { %v1504_v35 = vrot.slane %v1493_v33, %v3182_v46  ;;  %v2377_v36 = vpop.f32.mrb[25].mxu1 }
 0x58b   : > { %v1505_v38 = vcombine.high %v1504_v35, %v1504_v35  ;;  %v1508_v39 = vadd.f32 %v1504_v35, %v1339_v24 }
 0x58d   : > { %v1509_v41 = vadd.f32 %v1505_v38, %v1412_v31  ;;  %2381 = vmatmul.mubr.f32.vlgmr.msra.gmra.mrb[18].mxu0 %v1508_v39 }
 0x58e   : > { %2384 = vmatpush3.xpose.msra.mxu0 %v3198_v54  ;;  %2385 = vmatprep.mubr.msk.f32.mxu0 %vm2911_vm6, %v2909_v49 }
 0x58f   : > { %v1819_v42 = vcombine.low %v1508_v39, %v1509_v41  ;;  %2388 = vmatprep.subr.mxu0 %v2909_v49 }
 0x591   : > { %2386 = vmatmul.mubr.f32.vlgmr.msra.gmra.mrb[20].mxu0 %v1509_v41 }
 0x592   : > { %2389 = vmatpush3.msra.mxu0 %v3196_v53  ;;  %2390 = vmatprep.mubr.msk.f32.mxu0 %vm2911_vm6, %v2909_v49 }
 0x593   : > { %2393 = vmatprep.subr.mxu0 %v2909_v49 }
 0x660   : > { %v1576_v44 = vpop.f32.mrb[18].mxu0 }
 0x661   : > { %v2382_v45 = vpop.f32.mrb[19].mxu0  ;;  %v1650_v51 = vsel %vm857_vm7, %v1576_v44, -inf }
 0x664   : > { %v1646_v50 = vpop.f32.mrb[20].mxu0 }
 0x665   : > { %v1651_v54 = vsel %vm857_vm7, %v1646_v50, -inf  ;;  %v2387_v56 = vpop.f32.mrb[21].mxu0 }
 0x666   : > { %v1652_v57 = vmax.f32 %v1650_v51, %v1651_v54 }
 0x668   : > { %v1653_v58 = vsub.f32 %v1576_v44, %v1652_v57  ;;  %v1654_v59 = vsub.f32 %v1646_v50, %v1652_v57 }
 0x66a   : > { %v1655_v60 = vmul.f32 1.442695, %v1653_v58  ;;  %v1657_v61 = vmul.f32 1.442695, %v1654_v59 }
 0x66c   : > { %2697 = vpow2.f32 %v1655_v60 }
 0x66d   : > { %2699 = vpow2.f32 %v1657_v61 }
 0x676   : > { %v2698_v53 = vpop.eup %2697 }
 0x677   : > { %v2700_v62 = vpop.eup %2699  ;;  %v1659_v63 = vsel %vm857_vm7, %v2698_v53, 0.0 }
 0x678   : > { %v1660_v47 = vsel %vm857_vm7, %v2700_v62, 0.0 }
 0x679   : > { %v1661_v52 = vadd.f32 %v1660_v47, %v1659_v63 }
 0x67b   : > { %2701 = vrcp.f32 %v1661_v52 }
 0x685   : > { %v2702_v0 = vpop.eup %2701 }
 0x686   : > { %v1663_v1 = vmul.f32 %v2702_v0, %v1661_v52 }
 0x688   : > { %v1664_v2 = vsub.f32 2.0, %v1663_v1 }
 0x68a   : > { %v1665_v28 = vmul.f32 %v2702_v0, %v1664_v2 }
 0x68c   : > { %v1666_v3 = vmul.f32 %v1665_v28, %v1661_v52 }
 0x68e   : > { %v1667_v4 = vsub.f32 2.0, %v1666_v3 }
 0x690   : > { %v1668_v5 = vmul.f32 %v1667_v4, %v1665_v28 }
 0x692   : > { %v1669_v6 = vmul.f32 %v2698_v53, %v1668_v5  ;;  %v1670_v7 = vmul.f32 %v2700_v62, %v1668_v5 }
 0x694   : > { %2391 = vmatmul.mubr.msk.f32.vlgmr.msra.gmra.mrb[22].mxu0 %vm879_vm8, %v1669_v6 }
 0x695   : > { %2394 = vmatpush3.msra.mxu0 %v3200_v55  ;;  %2395 = vmatprep.mubr.msk.f32.mxu0 %vm2911_vm6, %v2909_v49  ;;  %v701_v55 = vld [vmem:[#allocation9 + $0x8] sm:$0xff] }
 0x696   : > { %2546 = vmatprep.subr.bf16.mxu0 %v2910_v9 }
 0x698   : > { %2396 = vmatmul.mubr.msk.f32.vlgmr.msra.gmra.mrb[24].mxu0 %vm879_vm8, %v1670_v7 }
 0x699   : > { %2548 = vmatpush3.bf16.msra.mxu0 %v3206_v20  ;;  %2430 = vmatprep.mubr.msk.f32.mxu0 %vm2911_vm6, %v2909_v49  ;;  %v1826_v49 = vrot.slane %v1819_v42, %v3182_v46  ;;  %v702_v20 = vld [vmem:[#allocation9 + $0x18] sm:$0xff] }
 0x69a   : > { %2549 = vmatprep.subr.bf16.mxu0 %v2910_v9 }
 0x69d   : > { %2551 = vmatpush3.bf16.msra.mxu0 %v3212_v27  ;;  %v703_v27 = vld [vmem:[#allocation9 + $0x28] sm:$0xff] }
 0x69e   : > { %2552 = vmatprep.subr.bf16.mxu0 %v2910_v9 }
 0x6a1   : > { %2554 = vmatpush3.bf16.msra.mxu0 %v3221_v32  ;;  %v2571_v32 = vpack.c.bf16 %v702_v20, %v701_v55 }
 0x6a2   : > { %2555 = vmatprep.subr.bf16.mxu0 %v2910_v9 }
 0x6a3   : > { %2572 = vmatpush3.bf16.msra.mxu1 %v2571_v32 }
 0x6a4   : > { %2573 = vmatprep.subr.bf16.mxu1 %v2910_v9 }
 0x6a5   : > { %2557 = vmatpush3.bf16.msra.mxu0 %v3225_v34  ;;  %v704_v34 = vld [vmem:[#allocation9 + $0x38] sm:$0xff] }
 0x6a6   : > { %2558 = vmatprep.subr.bf16.mxu0 %v2910_v9 }
 0x6a9   : > { %2560 = vmatpush3.bf16.msra.mxu0 %v3229_v37  ;;  %v2574_v37 = vpack.c.bf16 %v704_v34, %v703_v27 }
 0x6aa   : > { %2561 = vmatprep.subr.bf16.mxu0 %v2910_v9 }
 0x6ab   : > { %2575 = vmatpush3.bf16.msra.mxu1 %v2574_v37 }
 0x6ac   : > { %2576 = vmatprep.subr.bf16.mxu1 %v2910_v9 }
 0x6ad   : > { %2563 = vmatpush3.bf16.msra.mxu0 %v3233_v40  ;;  %v705_v40 = vld [vmem:[#allocation9 + $0x48] sm:$0xff] }
 0x6ae   : > { %2564 = vmatprep.subr.bf16.mxu0 %v2910_v9 }
 0x6b1   : > { %2566 = vmatpush3.bf16.msra.mxu0 %v3237_v43  ;;  %v2577_v43 = vpack.c.bf16 %v706_v8, %v705_v40 }
 0x6b2   : > { %2567 = vmatprep.subr.bf16.mxu0 %v2910_v9 }
 0x6b3   : > { %2578 = vmatpush3.bf16.msra.mxu1 %v2577_v43 }
 0x6b4   : > { %2579 = vmatprep.subr.bf16.mxu1 %v2910_v9 }
 0x6b5   : > { %2569 = vmatpush3.bf16.msra.mxu0 %v3241_v48  ;;  %v708_v48 = vld [vmem:[#allocation9 + $0x78] sm:$0xff] }
 0x6b6   : > { %v2580_v10 = vpack.c.bf16 %v708_v48, %v707_v26 }
 0x6b8   : > { %2431 = vmatmul.mubr.f32.vlgmr.msra.gmra.mrb[26].mxu0 %v1826_v49  ;;  %2581 = vmatpush3.bf16.msra.mxu1 %v2580_v10 }
 0x6b9   : > { %2582 = vmatprep.subr.bf16.mxu1 %v2910_v9 }
 0x6bc   : > { %2584 = vmatpush3.bf16.msra.mxu1 %v2583_v13 }
 0x6bd   : > { %2585 = vmatprep.subr.bf16.mxu1 %v2910_v9 }
 0x6c0   : > { %2587 = vmatpush3.bf16.msra.mxu1 %v2586_v16 }
 0x6c1   : > { %2588 = vmatprep.subr.bf16.mxu1 %v2910_v9 }
 0x6c4   : > { %2590 = vmatpush3.bf16.msra.mxu1 %v2589_v19 }
 0x6c5   : > { %2591 = vmatprep.subr.bf16.mxu1 %v2910_v9 }
 0x6c8   : > { %2593 = vmatpush3.bf16.msra.mxu1 %v2592_v23 }
 0x767   : > { %v1740_v30 = vpop.f32.mrb[22].mxu0 }
 0x768   : > { %v2392_v24 = vpop.f32.mrb[23].mxu0 }
 0x76b   : > { %v1813_v29 = vpop.f32.mrb[24].mxu0 }
 0x76c   : > { %v2397_v31 = vpop.f32.mrb[25].mxu0 }
 0x78b   : > { %v1894_v25 = vpop.f32.mrb[26].mxu0 }
 0x78c   : > { %v1905_v33 = vrot.slane %v1894_v25, %v3182_v46  ;;  %v2432_v35 = vpop.f32.mrb[27].mxu0 }
 0x78e   : > { %v1906_v36 = vcombine.high %v1905_v33, %v1905_v33  ;;  %v1909_v38 = vadd.f32 %v1905_v33, %v1740_v30 }
 0x790   : > { %v1910_v39 = vadd.f32 %v1906_v36, %v1813_v29 }
 0x792   : > { %v1913_v41 = vcombine.low %v1909_v38, %v1910_v39 }
 0x794   : > { %v1920_v42 = vrot.slane %v1913_v41, %v3182_v46 }
 0x796   : > { %2466 = vmatmul.mubr.f32.vlgmr.msra.gmra.mrb[26].mxu1 %v1920_v42 }
 0x869   : > { %v1988_v9 = vpop.f32.mrb[26].mxu1 }
 0x86a   : > { %v1999_v44 = vrot.slane %v1988_v9, %v3182_v46  ;;  %v2467_v45 = vpop.f32.mrb[27].mxu1 }
 0x86c   : > { %v2000_v50 = vcombine.high %v1999_v44, %v1999_v44  ;;  %v2004_v51 = vsel %vm2003_vm9, %v1999_v44, -inf }
 0x86e   : > { %v2005_v54 = vsel %vm2003_vm9, %v2000_v50, -inf }
 0x86f   : > { %v2006_v56 = vmax.f32 %v2004_v51, %v2005_v54 }
 0x871   : > { %v2007_v57 = vsub.f32 %v1999_v44, %v2006_v56  ;;  %v2008_v58 = vsub.f32 %v2000_v50, %v2006_v56 }
 0x873   : > { %v2009_v59 = vmul.f32 1.442695, %v2007_v57  ;;  %v2011_v60 = vmul.f32 1.442695, %v2008_v58 }
 0x875   : > { %2703 = vpow2.f32 %v2009_v59 }
 0x876   : > { %2705 = vpow2.f32 %v2011_v60 }
 0x87f   : > { %v2704_v61 = vpop.eup %2703 }
 0x880   : > { %v2706_v53 = vpop.eup %2705  ;;  %v2013_v62 = vsel %vm2003_vm9, %v2704_v61, 0.0 }
 0x881   : > { %v2014_v63 = vsel %vm2003_vm9, %v2706_v53, 0.0 }
 0x882   : > { %v2015_v47 = vadd.f32 %v2014_v63, %v2013_v62 }
 0x884   : > { %2707 = vrcp.f32 %v2015_v47 }
 0x88e   : > { %v2708_v52 = vpop.eup %2707 }
 0x88f   : > { %v2017_v46 = vmul.f32 %v2708_v52, %v2015_v47 }
 0x891   : > { %v2018_v0 = vsub.f32 2.0, %v2017_v46 }
 0x893   : > { %v2019_v1 = vmul.f32 %v2708_v52, %v2018_v0 }
 0x895   : > { %v2020_v2 = vmul.f32 %v2019_v1, %v2015_v47 }
 0x897   : > { %v2021_v28 = vsub.f32 2.0, %v2020_v2 }
 0x899   : > { %v2022_v3 = vmul.f32 %v2021_v28, %v2019_v1 }
 0x89b   : > { %v2023_v4 = vmul.f32 %v2704_v61, %v2022_v3  ;;  %v2024_v5 = vmul.f32 %v2706_v53, %v2022_v3 }
 0x89d   : > { %2025 = vst [vmem:[#allocation11] sm:$0x3] %v2023_v4  ;;  %2026 = vst [vmem:[#allocation11 + $0x2] sm:$0x3] %v2024_v5 }
 0x89e PF: > { %p2633_p11 = scmp.eq.s32.totalorder %s2960_s19, 3  ;;  %s2913_s25 = smov [#allocation11]  }
 0x89f   : > { %s2033_s26 = sshll.u32 %s2913_s25, 4  ;;  %s2034_s26 = int_to_ptr.vmem [resolvable:$true] %s2033_s26 }
 0x8a0   : > { %s2823_s30 = scalar_lea.vmem %s2034_s26, 64  ;;  %p2830_p10 = scmp.lt.s32.totalorder %s2034_s26, %s2034_s26 }
 0x8a1   : > { %p2824_p13 = scmp.ne.s32.totalorder %s2034_s26, %s2823_s30  ;;  %p2831_p0 = scmp.lt.s32.totalorder %s2823_s30, %s2823_s30 }
 0x8a3   : > { %p2825_p2 = pnand %p2824_p13, %p2633_p11  ;;  %p2832_p5 = por %p2831_p0, %p2830_p10 }
 0x8a5   : > { %p2826_p8 = pneg %p2825_p2 }
 0x8a7   : > { %p2833_p9 = pnand %p2832_p5, %p2826_p8 }
 0x8a9   : > { %2836 = shalt.err (!%p2833_p9)
}
 0x8aa   : > { %s2837_s29 = scalar_lea.hbm %s3378_s4, 64 }
 0x8ab   : > { %p2838_p1 = scmp.ne.s32.totalorder %s3378_s4, %s2837_s29  ;;  %p2843_p4 = scmp.lt.u32.totalorder %s2837_s29, %s3378_s4 }
 0x8ad   : > { %p2839_p12 = pnand %p2838_p1, %p2633_p11 }
 0x8af   : > { %p2840_p3 = pneg %p2839_p12 }
 0x8b1   : > { %p2845_p6 = pnand %p2843_p4, %p2840_p3 }
 0x8b3   : > { %2848 = shalt.err (!%p2845_p6)
}
 0x8b4   : > { %s2914_s7 = smov 32   ;;  %s2915_s14 = smov 2  }
 0x8b5   : > { %2609 = dma.vmem_to_hbm [thread:$0]  (%p2633_p11), %s2034_s26, 64, %s3378_s4, [#allocation5], %s2914_s7, %s2914_s7, %s2915_s14  }
 0x8b6   : > { %2878 = dma.done.wait (%p2633_p11), [#allocation5], 64  }
 0x8b7   : > { %2880 = vsyncadd (%p2633_p11), [#allocation5], 4294967232 }
 0x8b8 PF: > { %p17_p7 = scmp.ge.s32.totalorder %s2963_s20, 6   ;;  %s3401_s15 = smov %s2887_s16 }
 0x8b9   : > { %s3402_s16 = smov %s2891_s17  ;;  %s3403_s17 = smov %s2973_s23 }
 0x8ba   : > { %s3404_s18 = smov %s2963_s20  ;;  %19 = sbr.rel (!%p17_p7) target bundleno = 6 (0x6), region = 93 }
 0x8c1   :  { %2049 = vsyncpa [#allocation4], 1 }
 0x8c2   :  { %2051 = vsyncpa [#allocation4 + $0x1], 1 }
 0x8c3   :  { %2052 = vsyncpa [#allocation7], 1 }
 0x8c4   :  { %2053 = vsyncpa [#allocation10], 1 }
 0x8c5   :  { %2054 = vsyncpa [#allocation5], 1 }
 0x8c6   :  { %2056 = vsyncpa [#allocation5 + $0x1], 1 }

</bundles_post_ra>
